<compile_context>
chip_gen: v7x
topology: tpu7x:2x2x1
jax: 0.10.0
libtpu: 0.0.40
codegen_flags: <defaults>
</compile_context>

<pallas_src>
import jax
import jax.numpy as jnp
from jax.experimental import pallas as pl
from jax.experimental.pallas import tpu as pltpu

# ----------------------------- model dimensions (small synthetic config) -----------------------
B = 2                 # batch
SEQ = 8               # question tokens
REGIONS = 16          # visual regions
Q_OUT = 32            # question_out
VIS_OUT = 32          # visual_out
H_ATT = 24            # hidden_dimension_attention
H_CROSS = 40          # hidden_dimension_cross
FUSION_IN = 48        # fusion_in
MUTAN_MM = 32         # Mutan mm_dim
MUTAN_RANK = 3        # Mutan rank
FUSION_HIDDEN = 16    # fusion_hidden
NUM_ANSWERS = 2       # num_answers

# Fixed argument order for the fused kernel (weights stored as (in, out); score heads as
# a (1, H_ATT) row; Mutan merge layers rank-major).
PARAM_ORDER = (
    "saq_fc1_w", "saq_fc1_b", "saq_fc2_w", "saq_fc2_b",
    "ca_q_w", "ca_q_b", "ca_v_w", "ca_v_b",
    "sai_fc1_w", "sai_fc1_b", "sai_fc2_w", "sai_fc2_b",
    "linear_q_w", "linear_q_b", "linear_v_w", "linear_v_b",
    "mutan_lin0_w", "mutan_lin0_b", "mutan_lin1_w", "mutan_lin1_b",
    "mutan_merge0_w", "mutan_merge0_b", "mutan_merge1_w", "mutan_merge1_b",
    "mutan_out_w", "mutan_out_b",
    "linear1_w", "linear1_b", "linear2_w", "linear2_b",
)

PARAM_SHAPES = {
    "saq_fc1_w": (Q_OUT, H_ATT),          "saq_fc1_b": (1, H_ATT),
    "saq_fc2_w": (1, H_ATT),              "saq_fc2_b": (1, 1),
    "ca_q_w": (Q_OUT, H_CROSS),           "ca_q_b": (1, H_CROSS),
    "ca_v_w": (VIS_OUT, H_CROSS),         "ca_v_b": (1, H_CROSS),
    "sai_fc1_w": (H_CROSS, H_ATT),        "sai_fc1_b": (1, H_ATT),
    "sai_fc2_w": (1, H_ATT),              "sai_fc2_b": (1, 1),
    "linear_q_w": (Q_OUT, FUSION_IN),     "linear_q_b": (1, FUSION_IN),
    "linear_v_w": (VIS_OUT, FUSION_IN),   "linear_v_b": (1, FUSION_IN),
    "mutan_lin0_w": (FUSION_IN, MUTAN_MM),   "mutan_lin0_b": (1, MUTAN_MM),
    "mutan_lin1_w": (FUSION_IN, MUTAN_MM),   "mutan_lin1_b": (1, MUTAN_MM),
    "mutan_merge0_w": (MUTAN_RANK, MUTAN_MM, MUTAN_MM),
    "mutan_merge0_b": (MUTAN_RANK, 1, MUTAN_MM),
    "mutan_merge1_w": (MUTAN_RANK, MUTAN_MM, MUTAN_MM),
    "mutan_merge1_b": (MUTAN_RANK, 1, MUTAN_MM),
    "mutan_out_w": (MUTAN_MM, FUSION_IN), "mutan_out_b": (1, FUSION_IN),
    "linear1_w": (FUSION_IN, FUSION_HIDDEN), "linear1_b": (1, FUSION_HIDDEN),
    "linear2_w": (FUSION_HIDDEN, NUM_ANSWERS), "linear2_b": (1, NUM_ANSWERS),
}


# ----------------------------- fused Pallas kernel ----------------------------------------------

def fused_kernel(*refs):
    (q_ref, v_ref,
     saq_fc1_w, saq_fc1_b, saq_fc2_w, saq_fc2_b,
     ca_q_w, ca_q_b, ca_v_w, ca_v_b,
     sai_fc1_w, sai_fc1_b, sai_fc2_w, sai_fc2_b,
     linear_q_w, linear_q_b, linear_v_w, linear_v_b,
     mutan_lin0_w, mutan_lin0_b, mutan_lin1_w, mutan_lin1_b,
     mutan_merge0_w, mutan_merge0_b, mutan_merge1_w, mutan_merge1_b,
     mutan_out_w, mutan_out_b,
     linear1_w, linear1_b, linear2_w, linear2_b,
     o_ref) = refs

    q_tok = q_ref[0]        # (SEQ, Q_OUT)      one batch element per grid step
    v_reg = v_ref[0]        # (REGIONS, VIS_OUT)

    def lin(x, w_ref, b_ref, act=False):
        # MXU matmul + VPU bias / EUP tanh epilogue, all on-chip.
        y = jnp.dot(x, w_ref[...], preferred_element_type=jnp.float32) + b_ref[...]
        return jnp.tanh(y) if act else y

    def attend(feat, fc1_w, fc1_b, fc2_w, fc2_b, values):
        # linear -> tanh -> (lane-reduction score) -> softmax over rows -> weighted sum.
        h = lin(feat, fc1_w, fc1_b, act=True)                              # (T, H_ATT)
        # fc2 stored as a (1, H_ATT) row: score via lane reduction, no 1-wide matmul output.
        s = jnp.sum(h * fc2_w[...], axis=-1, keepdims=True) + fc2_b[...]   # (T, 1)
        m = jnp.max(s, axis=0, keepdims=True)
        e = jnp.exp(s - m)
        p = e / jnp.sum(e, axis=0, keepdims=True)                          # (T, 1)
        return jnp.sum(p * values, axis=0, keepdims=True)                  # (1, D_val)

    # dropoutQ / dropoutV / dropoutF: identity in eval mode.

    # --- SelfAttentionQuestion: pool question tokens into a single vector ---
    q_pool = attend(q_tok, saq_fc1_w, saq_fc1_b, saq_fc2_w, saq_fc2_b, q_tok)   # (1, Q_OUT)

    # --- CrossAttention: joint question/region embedding ---
    qp = lin(q_pool, ca_q_w, ca_q_b)                                            # (1, H_CROSS)
    vp = lin(v_reg, ca_v_w, ca_v_b)                                             # (R, H_CROSS)
    c = jnp.tanh(vp * qp)                                                       # (R, H_CROSS)

    # --- SelfAttentionImage: attend over regions using the cross features ---
    v_pool = attend(c, sai_fc1_w, sai_fc1_b, sai_fc2_w, sai_fc2_b, v_reg)       # (1, VIS_OUT)

    # --- projection into fusion space ---
    qf = lin(q_pool, linear_q_w, linear_q_b, act=True)                          # (1, FUSION_IN)
    vf = lin(v_pool, linear_v_w, linear_v_b, act=True)                          # (1, FUSION_IN)

    # --- Mutan fusion: fusion([v, q]) ---
    x0 = lin(vf, mutan_lin0_w, mutan_lin0_b)                                    # (1, MM)
    x1 = lin(qf, mutan_lin1_w, mutan_lin1_b)                                    # (1, MM)
    z = jnp.zeros((1, MUTAN_MM), jnp.float32)
    for r in range(MUTAN_RANK):   # rank-major weights: dense 32-lane blocks, no lane slicing
        m0 = jnp.dot(x0, mutan_merge0_w[r], preferred_element_type=jnp.float32) + mutan_merge0_b[r]
        m1 = jnp.dot(x1, mutan_merge1_w[r], preferred_element_type=jnp.float32) + mutan_merge1_b[r]
        z = z + m0 * m1
    z = lin(z, mutan_out_w, mutan_out_b)                                        # (1, FUSION_IN)

    # --- classification head ---
    x = lin(z, linear1_w, linear1_b, act=True)                                  # (1, FUSION_HIDDEN)
    logits = lin(x, linear2_w, linear2_b)                                       # (1, NUM_ANSWERS)

    o_ref[0] = logits


# ----------------------------- BlockSpec helpers -------------------------------------------------

def _replicated_spec(shape):
    # Full-array block, same block for every grid step (weights stay resident in VMEM).
    ndim = len(shape)

    def idx(b):
        return (0,) * ndim

    return pl.BlockSpec(tuple(shape), idx)


def _batched_spec(full_shape):
    # Block over the leading batch axis only; trailing dims are full (no (8,128) issues).
    ndim = len(full_shape)
    block = (1,) + tuple(full_shape[1:])

    def idx(b):
        return (b,) + (0,) * (ndim - 1)

    return pl.BlockSpec(block, idx)


# ----------------------------- forward pass -------------------------------------------------------

def custom_fusion_forward(params, input_v, input_q):
    """input_v: (B, REGIONS, VIS_OUT), input_q: (B, SEQ, Q_OUT) -> logits (B, NUM_ANSWERS)."""
    Bq = input_q.shape[0]
    flat_params = [params[name] for name in PARAM_ORDER]

    in_specs = [_batched_spec(input_q.shape), _batched_spec(input_v.shape)]
    in_specs += [_replicated_spec(p.shape) for p in flat_params]

    out = pl.pallas_call(
        fused_kernel,
        out_shape=jax.ShapeDtypeStruct((Bq, 1, NUM_ANSWERS), jnp.float32),
        grid=(Bq,),
        in_specs=in_specs,
        out_specs=_batched_spec((Bq, 1, NUM_ANSWERS)),
        compiler_params=pltpu.CompilerParams(dimension_semantics=("parallel",)),
    )(input_q, input_v, *flat_params)
    return out.reshape(Bq, NUM_ANSWERS)


# ----------------------------- pure-JAX reference (for validation) -------------------------------

def reference_forward(params, input_v, input_q):
    def lin(x, w, b, act=False):
        y = x @ w + b
        return jnp.tanh(y) if act else y

    def attend(feat, fc1_w, fc1_b, fc2_w, fc2_b, values):
        h = lin(feat, fc1_w, fc1_b, act=True)                              # (B, T, H)
        s = jnp.sum(h * fc2_w, axis=-1, keepdims=True) + fc2_b             # (B, T, 1)
        p = jax.nn.softmax(s, axis=1)
        return jnp.sum(p * values, axis=1)                                 # (B, D)

    q = attend(input_q, params["saq_fc1_w"], params["saq_fc1_b"],
               params["saq_fc2_w"], params["saq_fc2_b"], input_q)
    qp = lin(q, params["ca_q_w"], params["ca_q_b"])
    vp = lin(input_v, params["ca_v_w"], params["ca_v_b"])
    c = jnp.tanh(vp * qp[:, None, :])
    v = attend(c, params["sai_fc1_w"], params["sai_fc1_b"],
               params["sai_fc2_w"], params["sai_fc2_b"], input_v)
    qf = lin(q, params["linear_q_w"], params["linear_q_b"], act=True)
    vf = lin(v, params["linear_v_w"], params["linear_v_b"], act=True)
    x0 = lin(vf, params["mutan_lin0_w"], params["mutan_lin0_b"])
    x1 = lin(qf, params["mutan_lin1_w"], params["mutan_lin1_b"])
    z = jnp.zeros((x0.shape[0], MUTAN_MM), jnp.float32)
    for r in range(MUTAN_RANK):
        m0 = x0 @ params["mutan_merge0_w"][r] + params["mutan_merge0_b"][r]
        m1 = x1 @ params["mutan_merge1_w"][r] + params["mutan_merge1_b"][r]
        z = z + m0 * m1
    z = lin(z, params["mutan_out_w"], params["mutan_out_b"])
    x = lin(z, params["linear1_w"], params["linear1_b"], act=True)
    return lin(x, params["linear2_w"], params["linear2_b"])


# ----------------------------- parameters --------------------------------------------------------

def init_params(key):
    keys = jax.random.split(key, len(PARAM_ORDER))
    params = {}
    for name, k in zip(PARAM_ORDER, keys):
        shape = PARAM_SHAPES[name]
        if name.endswith("_w"):
            fan_in = shape[-2]
            scale = 1.0 / jnp.sqrt(jnp.float32(fan_in))
        else:
            scale = 0.01
        params[name] = jax.random.normal(k, shape, jnp.float32) * scale
    return params


# ----------------------------- main --------------------------------------------------------------

if __name__ == "__main__":
    key = jax.random.PRNGKey(0)
    kv, kq, kp = jax.random.split(key, 3)
    input_v = jax.random.normal(kv, (B, REGIONS, VIS_OUT), jnp.float32)
    input_q = jax.random.normal(kq, (B, SEQ, Q_OUT), jnp.float32)
    params = init_params(kp)

    out = custom_fusion_forward(params, input_v, input_q)
    out = jax.block_until_ready(out)

    assert out.shape == (B, NUM_ANSWERS), out.shape
    assert bool(jnp.all(jnp.isfinite(out)))

    ref = jax.block_until_ready(reference_forward(params, input_v, input_q))
    assert bool(jnp.allclose(out, ref, rtol=1e-2, atol=1e-2)), (out, ref)

    print("KERNEL_OK")
</pallas_src>

<mosaic_0001>
module attributes {stable_mosaic.version = 11 : i64} {
  func.func @fused_kernel(%arg0: i32, %arg1: memref<1x8x32xf32, #tpu.memory_space<vmem>>, %arg2: memref<1x16x32xf32, #tpu.memory_space<vmem>>, %arg3: memref<32x24xf32, #tpu.memory_space<vmem>>, %arg4: memref<1x24xf32, #tpu.memory_space<vmem>>, %arg5: memref<1x24xf32, #tpu.memory_space<vmem>>, %arg6: memref<1x1xf32, #tpu.memory_space<vmem>>, %arg7: memref<32x40xf32, #tpu.memory_space<vmem>>, %arg8: memref<1x40xf32, #tpu.memory_space<vmem>>, %arg9: memref<32x40xf32, #tpu.memory_space<vmem>>, %arg10: memref<1x40xf32, #tpu.memory_space<vmem>>, %arg11: memref<40x24xf32, #tpu.memory_space<vmem>>, %arg12: memref<1x24xf32, #tpu.memory_space<vmem>>, %arg13: memref<1x24xf32, #tpu.memory_space<vmem>>, %arg14: memref<1x1xf32, #tpu.memory_space<vmem>>, %arg15: memref<32x48xf32, #tpu.memory_space<vmem>>, %arg16: memref<1x48xf32, #tpu.memory_space<vmem>>, %arg17: memref<32x48xf32, #tpu.memory_space<vmem>>, %arg18: memref<1x48xf32, #tpu.memory_space<vmem>>, %arg19: memref<48x32xf32, #tpu.memory_space<vmem>>, %arg20: memref<1x32xf32, #tpu.memory_space<vmem>>, %arg21: memref<48x32xf32, #tpu.memory_space<vmem>>, %arg22: memref<1x32xf32, #tpu.memory_space<vmem>>, %arg23: memref<3x32x32xf32, #tpu.memory_space<vmem>>, %arg24: memref<3x1x32xf32, #tpu.memory_space<vmem>>, %arg25: memref<3x32x32xf32, #tpu.memory_space<vmem>>, %arg26: memref<3x1x32xf32, #tpu.memory_space<vmem>>, %arg27: memref<32x48xf32, #tpu.memory_space<vmem>>, %arg28: memref<1x48xf32, #tpu.memory_space<vmem>>, %arg29: memref<48x16xf32, #tpu.memory_space<vmem>>, %arg30: memref<1x16xf32, #tpu.memory_space<vmem>>, %arg31: memref<16x2xf32, #tpu.memory_space<vmem>>, %arg32: memref<1x2xf32, #tpu.memory_space<vmem>>, %arg33: memref<1x1x2xf32, #tpu.memory_space<vmem>>) attributes {dimension_semantics = [#tpu.dimension_semantics<parallel>], iteration_bounds = array<i64: 2>, scalar_prefetch = 0 : i64, scratch_operands = 0 : i64, tpu.core_type = #tpu.core_type<tc>, window_params = [{transform_indices = @transform_0, window_bounds = array<i64: 1, 8, 32>}, {transform_indices = @transform_1, window_bounds = array<i64: 1, 16, 32>}, {pipeline_mode = #tpu.pipeline_mode<synchronous>, transform_indices = @transform_2, window_bounds = array<i64: 32, 24>}, {pipeline_mode = #tpu.pipeline_mode<synchronous>, transform_indices = @transform_3, window_bounds = array<i64: 1, 24>}, {pipeline_mode = #tpu.pipeline_mode<synchronous>, transform_indices = @transform_4, window_bounds = array<i64: 1, 24>}, {pipeline_mode = #tpu.pipeline_mode<synchronous>, transform_indices = @transform_5, window_bounds = array<i64: 1, 1>}, {pipeline_mode = #tpu.pipeline_mode<synchronous>, transform_indices = @transform_6, window_bounds = array<i64: 32, 40>}, {pipeline_mode = #tpu.pipeline_mode<synchronous>, transform_indices = @transform_7, window_bounds = array<i64: 1, 40>}, {pipeline_mode = #tpu.pipeline_mode<synchronous>, transform_indices = @transform_8, window_bounds = array<i64: 32, 40>}, {pipeline_mode = #tpu.pipeline_mode<synchronous>, transform_indices = @transform_9, window_bounds = array<i64: 1, 40>}, {pipeline_mode = #tpu.pipeline_mode<synchronous>, transform_indices = @transform_10, window_bounds = array<i64: 40, 24>}, {pipeline_mode = #tpu.pipeline_mode<synchronous>, transform_indices = @transform_11, window_bounds = array<i64: 1, 24>}, {pipeline_mode = #tpu.pipeline_mode<synchronous>, transform_indices = @transform_12, window_bounds = array<i64: 1, 24>}, {pipeline_mode = #tpu.pipeline_mode<synchronous>, transform_indices = @transform_13, window_bounds = array<i64: 1, 1>}, {pipeline_mode = #tpu.pipeline_mode<synchronous>, transform_indices = @transform_14, window_bounds = array<i64: 32, 48>}, {pipeline_mode = #tpu.pipeline_mode<synchronous>, transform_indices = @transform_15, window_bounds = array<i64: 1, 48>}, {pipeline_mode = #tpu.pipeline_mode<synchronous>, transform_indices = @transform_16, window_bounds = array<i64: 32, 48>}, {pipeline_mode = #tpu.pipeline_mode<synchronous>, transform_indices = @transform_17, window_bounds = array<i64: 1, 48>}, {pipeline_mode = #tpu.pipeline_mode<synchronous>, transform_indices = @transform_18, window_bounds = array<i64: 48, 32>}, {pipeline_mode = #tpu.pipeline_mode<synchronous>, transform_indices = @transform_19, window_bounds = array<i64: 1, 32>}, {pipeline_mode = #tpu.pipeline_mode<synchronous>, transform_indices = @transform_20, window_bounds = array<i64: 48, 32>}, {pipeline_mode = #tpu.pipeline_mode<synchronous>, transform_indices = @transform_21, window_bounds = array<i64: 1, 32>}, {pipeline_mode = #tpu.pipeline_mode<synchronous>, transform_indices = @transform_22, window_bounds = array<i64: 3, 32, 32>}, {pipeline_mode = #tpu.pipeline_mode<synchronous>, transform_indices = @transform_23, window_bounds = array<i64: 3, 1, 32>}, {pipeline_mode = #tpu.pipeline_mode<synchronous>, transform_indices = @transform_24, window_bounds = array<i64: 3, 32, 32>}, {pipeline_mode = #tpu.pipeline_mode<synchronous>, transform_indices = @transform_25, window_bounds = array<i64: 3, 1, 32>}, {pipeline_mode = #tpu.pipeline_mode<synchronous>, transform_indices = @transform_26, window_bounds = array<i64: 32, 48>}, {pipeline_mode = #tpu.pipeline_mode<synchronous>, transform_indices = @transform_27, window_bounds = array<i64: 1, 48>}, {pipeline_mode = #tpu.pipeline_mode<synchronous>, transform_indices = @transform_28, window_bounds = array<i64: 48, 16>}, {pipeline_mode = #tpu.pipeline_mode<synchronous>, transform_indices = @transform_29, window_bounds = array<i64: 1, 16>}, {pipeline_mode = #tpu.pipeline_mode<synchronous>, transform_indices = @transform_30, window_bounds = array<i64: 16, 2>}, {pipeline_mode = #tpu.pipeline_mode<synchronous>, transform_indices = @transform_31, window_bounds = array<i64: 1, 2>}, {transform_indices = @transform_32, window_bounds = array<i64: 1, 1, 2>}]} {
    %c0 = arith.constant 0 : index
    %c0_0 = arith.constant 0 : index
    %c0_1 = arith.constant 0 : index
    %0 = vector.load %arg1[%c0, %c0_0, %c0_1] : memref<1x8x32xf32, #tpu.memory_space<vmem>>, vector<1x8x32xf32>
    %1 = vector.shape_cast %0 : vector<1x8x32xf32> to vector<8x32xf32>
    %c0_2 = arith.constant 0 : index
    %c0_3 = arith.constant 0 : index
    %c0_4 = arith.constant 0 : index
    %2 = vector.load %arg2[%c0_2, %c0_3, %c0_4] : memref<1x16x32xf32, #tpu.memory_space<vmem>>, vector<1x16x32xf32>
    %3 = vector.shape_cast %2 : vector<1x16x32xf32> to vector<16x32xf32>
    %c0_5 = arith.constant 0 : index
    %c0_6 = arith.constant 0 : index
    %4 = vector.load %arg3[%c0_5, %c0_6] : memref<32x24xf32, #tpu.memory_space<vmem>>, vector<32x24xf32>
    %cst = arith.constant dense<0.000000e+00> : vector<8x24xf32>
    %5 = tpu.matmul %1, %4, %cst {dimension_numbers = #tpu.dot_dimension_numbers<[1], [0], [0], [1], [0, 0, 1, 1], [], []>} : vector<8x32xf32>, vector<32x24xf32>, vector<8x24xf32> -> vector<8x24xf32>
    %c0_7 = arith.constant 0 : index
    %c0_8 = arith.constant 0 : index
    %6 = vector.load %arg4[%c0_7, %c0_8] : memref<1x24xf32, #tpu.memory_space<vmem>>, vector<1x24xf32>
    %7 = vector.broadcast %6 : vector<1x24xf32> to vector<8x24xf32>
    %8 = arith.addf %5, %7 : vector<8x24xf32>
    %9 = math.tanh %8 : vector<8x24xf32>
    %c0_9 = arith.constant 0 : index
    %c0_10 = arith.constant 0 : index
    %10 = vector.load %arg5[%c0_9, %c0_10] : memref<1x24xf32, #tpu.memory_space<vmem>>, vector<1x24xf32>
    %11 = vector.broadcast %10 : vector<1x24xf32> to vector<8x24xf32>
    %12 = arith.mulf %9, %11 : vector<8x24xf32>
    %cst_11 = arith.constant dense<0.000000e+00> : vector<8xf32>
    %13 = vector.multi_reduction <add>, %12, %cst_11 [1] : vector<8x24xf32> to vector<8xf32>
    %14 = vector.shape_cast %13 : vector<8xf32> to vector<8x1xf32>
    %c0_12 = arith.constant 0 : index
    %c0_13 = arith.constant 0 : index
    %15 = vector.load %arg6[%c0_12, %c0_13] : memref<1x1xf32, #tpu.memory_space<vmem>>, vector<1x1xf32>
    %16 = vector.broadcast %15 : vector<1x1xf32> to vector<8x1xf32>
    %17 = arith.addf %14, %16 : vector<8x1xf32>
    %cst_14 = arith.constant dense<0xFF800000> : vector<1xf32>
    %18 = vector.multi_reduction <maximumf>, %17, %cst_14 [0] : vector<8x1xf32> to vector<1xf32>
    %19 = vector.shape_cast %18 : vector<1xf32> to vector<1x1xf32>
    %20 = vector.broadcast %19 : vector<1x1xf32> to vector<8x1xf32>
    %21 = arith.subf %17, %20 : vector<8x1xf32>
    %22 = math.exp %21 : vector<8x1xf32>
    %cst_15 = arith.constant dense<0.000000e+00> : vector<1xf32>
    %23 = vector.multi_reduction <add>, %22, %cst_15 [0] : vector<8x1xf32> to vector<1xf32>
    %24 = vector.shape_cast %23 : vector<1xf32> to vector<1x1xf32>
    %25 = vector.broadcast %24 : vector<1x1xf32> to vector<8x1xf32>
    %26 = arith.divf %22, %25 : vector<8x1xf32>
    %27 = vector.broadcast %26 : vector<8x1xf32> to vector<8x32xf32>
    %28 = arith.mulf %27, %1 : vector<8x32xf32>
    %cst_16 = arith.constant dense<0.000000e+00> : vector<32xf32>
    %29 = vector.multi_reduction <add>, %28, %cst_16 [0] : vector<8x32xf32> to vector<32xf32>
    %30 = vector.shape_cast %29 : vector<32xf32> to vector<1x32xf32>
    %c0_17 = arith.constant 0 : index
    %c0_18 = arith.constant 0 : index
    %31 = vector.load %arg7[%c0_17, %c0_18] : memref<32x40xf32, #tpu.memory_space<vmem>>, vector<32x40xf32>
    %cst_19 = arith.constant dense<0.000000e+00> : vector<1x40xf32>
    %32 = tpu.matmul %30, %31, %cst_19 {dimension_numbers = #tpu.dot_dimension_numbers<[1], [0], [0], [1], [0, 0, 1, 1], [], []>} : vector<1x32xf32>, vector<32x40xf32>, vector<1x40xf32> -> vector<1x40xf32>
    %c0_20 = arith.constant 0 : index
    %c0_21 = arith.constant 0 : index
    %33 = vector.load %arg8[%c0_20, %c0_21] : memref<1x40xf32, #tpu.memory_space<vmem>>, vector<1x40xf32>
    %34 = arith.addf %32, %33 : vector<1x40xf32>
    %c0_22 = arith.constant 0 : index
    %c0_23 = arith.constant 0 : index
    %35 = vector.load %arg9[%c0_22, %c0_23] : memref<32x40xf32, #tpu.memory_space<vmem>>, vector<32x40xf32>
    %cst_24 = arith.constant dense<0.000000e+00> : vector<16x40xf32>
    %36 = tpu.matmul %3, %35, %cst_24 {dimension_numbers = #tpu.dot_dimension_numbers<[1], [0], [0], [1], [0, 0, 1, 1], [], []>} : vector<16x32xf32>, vector<32x40xf32>, vector<16x40xf32> -> vector<16x40xf32>
    %c0_25 = arith.constant 0 : index
    %c0_26 = arith.constant 0 : index
    %37 = vector.load %arg10[%c0_25, %c0_26] : memref<1x40xf32, #tpu.memory_space<vmem>>, vector<1x40xf32>
    %38 = vector.broadcast %37 : vector<1x40xf32> to vector<16x40xf32>
    %39 = arith.addf %36, %38 : vector<16x40xf32>
    %40 = vector.broadcast %34 : vector<1x40xf32> to vector<16x40xf32>
    %41 = arith.mulf %39, %40 : vector<16x40xf32>
    %42 = math.tanh %41 : vector<16x40xf32>
    %c0_27 = arith.constant 0 : index
    %c0_28 = arith.constant 0 : index
    %43 = vector.load %arg11[%c0_27, %c0_28] : memref<40x24xf32, #tpu.memory_space<vmem>>, vector<40x24xf32>
    %cst_29 = arith.constant dense<0.000000e+00> : vector<16x24xf32>
    %44 = tpu.matmul %42, %43, %cst_29 {dimension_numbers = #tpu.dot_dimension_numbers<[1], [0], [0], [1], [0, 0, 1, 1], [], []>} : vector<16x40xf32>, vector<40x24xf32>, vector<16x24xf32> -> vector<16x24xf32>
    %c0_30 = arith.constant 0 : index
    %c0_31 = arith.constant 0 : index
    %45 = vector.load %arg12[%c0_30, %c0_31] : memref<1x24xf32, #tpu.memory_space<vmem>>, vector<1x24xf32>
    %46 = vector.broadcast %45 : vector<1x24xf32> to vector<16x24xf32>
    %47 = arith.addf %44, %46 : vector<16x24xf32>
    %48 = math.tanh %47 : vector<16x24xf32>
    %c0_32 = arith.constant 0 : index
    %c0_33 = arith.constant 0 : index
    %49 = vector.load %arg13[%c0_32, %c0_33] : memref<1x24xf32, #tpu.memory_space<vmem>>, vector<1x24xf32>
    %50 = vector.broadcast %49 : vector<1x24xf32> to vector<16x24xf32>
    %51 = arith.mulf %48, %50 : vector<16x24xf32>
    %cst_34 = arith.constant dense<0.000000e+00> : vector<16xf32>
    %52 = vector.multi_reduction <add>, %51, %cst_34 [1] : vector<16x24xf32> to vector<16xf32>
    %53 = vector.shape_cast %52 : vector<16xf32> to vector<16x1xf32>
    %c0_35 = arith.constant 0 : index
    %c0_36 = arith.constant 0 : index
    %54 = vector.load %arg14[%c0_35, %c0_36] : memref<1x1xf32, #tpu.memory_space<vmem>>, vector<1x1xf32>
    %55 = vector.broadcast %54 : vector<1x1xf32> to vector<16x1xf32>
    %56 = arith.addf %53, %55 : vector<16x1xf32>
    %cst_37 = arith.constant dense<0xFF800000> : vector<1xf32>
    %57 = vector.multi_reduction <maximumf>, %56, %cst_37 [0] : vector<16x1xf32> to vector<1xf32>
    %58 = vector.shape_cast %57 : vector<1xf32> to vector<1x1xf32>
    %59 = vector.broadcast %58 : vector<1x1xf32> to vector<16x1xf32>
    %60 = arith.subf %56, %59 : vector<16x1xf32>
    %61 = math.exp %60 : vector<16x1xf32>
    %cst_38 = arith.constant dense<0.000000e+00> : vector<1xf32>
    %62 = vector.multi_reduction <add>, %61, %cst_38 [0] : vector<16x1xf32> to vector<1xf32>
    %63 = vector.shape_cast %62 : vector<1xf32> to vector<1x1xf32>
    %64 = vector.broadcast %63 : vector<1x1xf32> to vector<16x1xf32>
    %65 = arith.divf %61, %64 : vector<16x1xf32>
    %66 = vector.broadcast %65 : vector<16x1xf32> to vector<16x32xf32>
    %67 = arith.mulf %66, %3 : vector<16x32xf32>
    %cst_39 = arith.constant dense<0.000000e+00> : vector<32xf32>
    %68 = vector.multi_reduction <add>, %67, %cst_39 [0] : vector<16x32xf32> to vector<32xf32>
    %69 = vector.shape_cast %68 : vector<32xf32> to vector<1x32xf32>
    %c0_40 = arith.constant 0 : index
    %c0_41 = arith.constant 0 : index
    %70 = vector.load %arg15[%c0_40, %c0_41] : memref<32x48xf32, #tpu.memory_space<vmem>>, vector<32x48xf32>
    %cst_42 = arith.constant dense<0.000000e+00> : vector<1x48xf32>
    %71 = tpu.matmul %30, %70, %cst_42 {dimension_numbers = #tpu.dot_dimension_numbers<[1], [0], [0], [1], [0, 0, 1, 1], [], []>} : vector<1x32xf32>, vector<32x48xf32>, vector<1x48xf32> -> vector<1x48xf32>
    %c0_43 = arith.constant 0 : index
    %c0_44 = arith.constant 0 : index
    %72 = vector.load %arg16[%c0_43, %c0_44] : memref<1x48xf32, #tpu.memory_space<vmem>>, vector<1x48xf32>
    %73 = arith.addf %71, %72 : vector<1x48xf32>
    %74 = math.tanh %73 : vector<1x48xf32>
    %c0_45 = arith.constant 0 : index
    %c0_46 = arith.constant 0 : index
    %75 = vector.load %arg17[%c0_45, %c0_46] : memref<32x48xf32, #tpu.memory_space<vmem>>, vector<32x48xf32>
    %cst_47 = arith.constant dense<0.000000e+00> : vector<1x48xf32>
    %76 = tpu.matmul %69, %75, %cst_47 {dimension_numbers = #tpu.dot_dimension_numbers<[1], [0], [0], [1], [0, 0, 1, 1], [], []>} : vector<1x32xf32>, vector<32x48xf32>, vector<1x48xf32> -> vector<1x48xf32>
    %c0_48 = arith.constant 0 : index
    %c0_49 = arith.constant 0 : index
    %77 = vector.load %arg18[%c0_48, %c0_49] : memref<1x48xf32, #tpu.memory_space<vmem>>, vector<1x48xf32>
    %78 = arith.addf %76, %77 : vector<1x48xf32>
    %79 = math.tanh %78 : vector<1x48xf32>
    %c0_50 = arith.constant 0 : index
    %c0_51 = arith.constant 0 : index
    %80 = vector.load %arg19[%c0_50, %c0_51] : memref<48x32xf32, #tpu.memory_space<vmem>>, vector<48x32xf32>
    %cst_52 = arith.constant dense<0.000000e+00> : vector<1x32xf32>
    %81 = tpu.matmul %79, %80, %cst_52 {dimension_numbers = #tpu.dot_dimension_numbers<[1], [0], [0], [1], [0, 0, 1, 1], [], []>} : vector<1x48xf32>, vector<48x32xf32>, vector<1x32xf32> -> vector<1x32xf32>
    %c0_53 = arith.constant 0 : index
    %c0_54 = arith.constant 0 : index
    %82 = vector.load %arg20[%c0_53, %c0_54] : memref<1x32xf32, #tpu.memory_space<vmem>>, vector<1x32xf32>
    %83 = arith.addf %81, %82 : vector<1x32xf32>
    %c0_55 = arith.constant 0 : index
    %c0_56 = arith.constant 0 : index
    %84 = vector.load %arg21[%c0_55, %c0_56] : memref<48x32xf32, #tpu.memory_space<vmem>>, vector<48x32xf32>
    %cst_57 = arith.constant dense<0.000000e+00> : vector<1x32xf32>
    %85 = tpu.matmul %74, %84, %cst_57 {dimension_numbers = #tpu.dot_dimension_numbers<[1], [0], [0], [1], [0, 0, 1, 1], [], []>} : vector<1x48xf32>, vector<48x32xf32>, vector<1x32xf32> -> vector<1x32xf32>
    %c0_58 = arith.constant 0 : index
    %c0_59 = arith.constant 0 : index
    %86 = vector.load %arg22[%c0_58, %c0_59] : memref<1x32xf32, #tpu.memory_space<vmem>>, vector<1x32xf32>
    %87 = arith.addf %85, %86 : vector<1x32xf32>
    %cst_60 = arith.constant 0.000000e+00 : f32
    %88 = vector.broadcast %cst_60 : f32 to vector<1x32xf32>
    %c0_61 = arith.constant 0 : index
    %c0_62 = arith.constant 0 : index
    %c0_63 = arith.constant 0 : index
    %89 = vector.load %arg23[%c0_61, %c0_62, %c0_63] : memref<3x32x32xf32, #tpu.memory_space<vmem>>, vector<1x32x32xf32>
    %90 = vector.shape_cast %89 : vector<1x32x32xf32> to vector<32x32xf32>
    %cst_64 = arith.constant dense<0.000000e+00> : vector<1x32xf32>
    %91 = tpu.matmul %83, %90, %cst_64 {dimension_numbers = #tpu.dot_dimension_numbers<[1], [0], [0], [1], [0, 0, 1, 1], [], []>} : vector<1x32xf32>, vector<32x32xf32>, vector<1x32xf32> -> vector<1x32xf32>
    %c0_65 = arith.constant 0 : index
    %c0_66 = arith.constant 0 : index
    %c0_67 = arith.constant 0 : index
    %92 = vector.load %arg24[%c0_65, %c0_66, %c0_67] : memref<3x1x32xf32, #tpu.memory_space<vmem>>, vector<1x1x32xf32>
    %93 = vector.shape_cast %92 : vector<1x1x32xf32> to vector<1x32xf32>
    %94 = arith.addf %91, %93 : vector<1x32xf32>
    %c0_68 = arith.constant 0 : index
    %c0_69 = arith.constant 0 : index
    %c0_70 = arith.constant 0 : index
    %95 = vector.load %arg25[%c0_68, %c0_69, %c0_70] : memref<3x32x32xf32, #tpu.memory_space<vmem>>, vector<1x32x32xf32>
    %96 = vector.shape_cast %95 : vector<1x32x32xf32> to vector<32x32xf32>
    %cst_71 = arith.constant dense<0.000000e+00> : vector<1x32xf32>
    %97 = tpu.matmul %87, %96, %cst_71 {dimension_numbers = #tpu.dot_dimension_numbers<[1], [0], [0], [1], [0, 0, 1, 1], [], []>} : vector<1x32xf32>, vector<32x32xf32>, vector<1x32xf32> -> vector<1x32xf32>
    %c0_72 = arith.constant 0 : index
    %c0_73 = arith.constant 0 : index
    %c0_74 = arith.constant 0 : index
    %98 = vector.load %arg26[%c0_72, %c0_73, %c0_74] : memref<3x1x32xf32, #tpu.memory_space<vmem>>, vector<1x1x32xf32>
    %99 = vector.shape_cast %98 : vector<1x1x32xf32> to vector<1x32xf32>
    %100 = arith.addf %97, %99 : vector<1x32xf32>
    %101 = arith.mulf %94, %100 : vector<1x32xf32>
    %102 = arith.addf %88, %101 : vector<1x32xf32>
    %c1 = arith.constant 1 : index
    %c0_75 = arith.constant 0 : index
    %c0_76 = arith.constant 0 : index
    %103 = vector.load %arg23[%c1, %c0_75, %c0_76] : memref<3x32x32xf32, #tpu.memory_space<vmem>>, vector<1x32x32xf32>
    %104 = vector.shape_cast %103 : vector<1x32x32xf32> to vector<32x32xf32>
    %cst_77 = arith.constant dense<0.000000e+00> : vector<1x32xf32>
    %105 = tpu.matmul %83, %104, %cst_77 {dimension_numbers = #tpu.dot_dimension_numbers<[1], [0], [0], [1], [0, 0, 1, 1], [], []>} : vector<1x32xf32>, vector<32x32xf32>, vector<1x32xf32> -> vector<1x32xf32>
    %c1_78 = arith.constant 1 : index
    %c0_79 = arith.constant 0 : index
    %c0_80 = arith.constant 0 : index
    %106 = vector.load %arg24[%c1_78, %c0_79, %c0_80] : memref<3x1x32xf32, #tpu.memory_space<vmem>>, vector<1x1x32xf32>
    %107 = vector.shape_cast %106 : vector<1x1x32xf32> to vector<1x32xf32>
    %108 = arith.addf %105, %107 : vector<1x32xf32>
    %c1_81 = arith.constant 1 : index
    %c0_82 = arith.constant 0 : index
    %c0_83 = arith.constant 0 : index
    %109 = vector.load %arg25[%c1_81, %c0_82, %c0_83] : memref<3x32x32xf32, #tpu.memory_space<vmem>>, vector<1x32x32xf32>
    %110 = vector.shape_cast %109 : vector<1x32x32xf32> to vector<32x32xf32>
    %cst_84 = arith.constant dense<0.000000e+00> : vector<1x32xf32>
    %111 = tpu.matmul %87, %110, %cst_84 {dimension_numbers = #tpu.dot_dimension_numbers<[1], [0], [0], [1], [0, 0, 1, 1], [], []>} : vector<1x32xf32>, vector<32x32xf32>, vector<1x32xf32> -> vector<1x32xf32>
    %c1_85 = arith.constant 1 : index
    %c0_86 = arith.constant 0 : index
    %c0_87 = arith.constant 0 : index
    %112 = vector.load %arg26[%c1_85, %c0_86, %c0_87] : memref<3x1x32xf32, #tpu.memory_space<vmem>>, vector<1x1x32xf32>
    %113 = vector.shape_cast %112 : vector<1x1x32xf32> to vector<1x32xf32>
    %114 = arith.addf %111, %113 : vector<1x32xf32>
    %115 = arith.mulf %108, %114 : vector<1x32xf32>
    %116 = arith.addf %102, %115 : vector<1x32xf32>
    %c2 = arith.constant 2 : index
    %c0_88 = arith.constant 0 : index
    %c0_89 = arith.constant 0 : index
    %117 = vector.load %arg23[%c2, %c0_88, %c0_89] : memref<3x32x32xf32, #tpu.memory_space<vmem>>, vector<1x32x32xf32>
    %118 = vector.shape_cast %117 : vector<1x32x32xf32> to vector<32x32xf32>
    %cst_90 = arith.constant dense<0.000000e+00> : vector<1x32xf32>
    %119 = tpu.matmul %83, %118, %cst_90 {dimension_numbers = #tpu.dot_dimension_numbers<[1], [0], [0], [1], [0, 0, 1, 1], [], []>} : vector<1x32xf32>, vector<32x32xf32>, vector<1x32xf32> -> vector<1x32xf32>
    %c2_91 = arith.constant 2 : index
    %c0_92 = arith.constant 0 : index
    %c0_93 = arith.constant 0 : index
    %120 = vector.load %arg24[%c2_91, %c0_92, %c0_93] : memref<3x1x32xf32, #tpu.memory_space<vmem>>, vector<1x1x32xf32>
    %121 = vector.shape_cast %120 : vector<1x1x32xf32> to vector<1x32xf32>
    %122 = arith.addf %119, %121 : vector<1x32xf32>
    %c2_94 = arith.constant 2 : index
    %c0_95 = arith.constant 0 : index
    %c0_96 = arith.constant 0 : index
    %123 = vector.load %arg25[%c2_94, %c0_95, %c0_96] : memref<3x32x32xf32, #tpu.memory_space<vmem>>, vector<1x32x32xf32>
    %124 = vector.shape_cast %123 : vector<1x32x32xf32> to vector<32x32xf32>
    %cst_97 = arith.constant dense<0.000000e+00> : vector<1x32xf32>
    %125 = tpu.matmul %87, %124, %cst_97 {dimension_numbers = #tpu.dot_dimension_numbers<[1], [0], [0], [1], [0, 0, 1, 1], [], []>} : vector<1x32xf32>, vector<32x32xf32>, vector<1x32xf32> -> vector<1x32xf32>
    %c2_98 = arith.constant 2 : index
    %c0_99 = arith.constant 0 : index
    %c0_100 = arith.constant 0 : index
    %126 = vector.load %arg26[%c2_98, %c0_99, %c0_100] : memref<3x1x32xf32, #tpu.memory_space<vmem>>, vector<1x1x32xf32>
    %127 = vector.shape_cast %126 : vector<1x1x32xf32> to vector<1x32xf32>
    %128 = arith.addf %125, %127 : vector<1x32xf32>
    %129 = arith.mulf %122, %128 : vector<1x32xf32>
    %130 = arith.addf %116, %129 : vector<1x32xf32>
    %c0_101 = arith.constant 0 : index
    %c0_102 = arith.constant 0 : index
    %131 = vector.load %arg27[%c0_101, %c0_102] : memref<32x48xf32, #tpu.memory_space<vmem>>, vector<32x48xf32>
    %cst_103 = arith.constant dense<0.000000e+00> : vector<1x48xf32>
    %132 = tpu.matmul %130, %131, %cst_103 {dimension_numbers = #tpu.dot_dimension_numbers<[1], [0], [0], [1], [0, 0, 1, 1], [], []>} : vector<1x32xf32>, vector<32x48xf32>, vector<1x48xf32> -> vector<1x48xf32>
    %c0_104 = arith.constant 0 : index
    %c0_105 = arith.constant 0 : index
    %133 = vector.load %arg28[%c0_104, %c0_105] : memref<1x48xf32, #tpu.memory_space<vmem>>, vector<1x48xf32>
    %134 = arith.addf %132, %133 : vector<1x48xf32>
    %c0_106 = arith.constant 0 : index
    %c0_107 = arith.constant 0 : index
    %135 = vector.load %arg29[%c0_106, %c0_107] : memref<48x16xf32, #tpu.memory_space<vmem>>, vector<48x16xf32>
    %cst_108 = arith.constant dense<0.000000e+00> : vector<1x16xf32>
    %136 = tpu.matmul %134, %135, %cst_108 {dimension_numbers = #tpu.dot_dimension_numbers<[1], [0], [0], [1], [0, 0, 1, 1], [], []>} : vector<1x48xf32>, vector<48x16xf32>, vector<1x16xf32> -> vector<1x16xf32>
    %c0_109 = arith.constant 0 : index
    %c0_110 = arith.constant 0 : index
    %137 = vector.load %arg30[%c0_109, %c0_110] : memref<1x16xf32, #tpu.memory_space<vmem>>, vector<1x16xf32>
    %138 = arith.addf %136, %137 : vector<1x16xf32>
    %139 = math.tanh %138 : vector<1x16xf32>
    %c0_111 = arith.constant 0 : index
    %c0_112 = arith.constant 0 : index
    %140 = vector.load %arg31[%c0_111, %c0_112] : memref<16x2xf32, #tpu.memory_space<vmem>>, vector<16x2xf32>
    %cst_113 = arith.constant dense<0.000000e+00> : vector<1x2xf32>
    %141 = tpu.matmul %139, %140, %cst_113 {dimension_numbers = #tpu.dot_dimension_numbers<[1], [0], [0], [1], [0, 0, 1, 1], [], []>} : vector<1x16xf32>, vector<16x2xf32>, vector<1x2xf32> -> vector<1x2xf32>
    %c0_114 = arith.constant 0 : index
    %c0_115 = arith.constant 0 : index
    %142 = vector.load %arg32[%c0_114, %c0_115] : memref<1x2xf32, #tpu.memory_space<vmem>>, vector<1x2xf32>
    %143 = arith.addf %141, %142 : vector<1x2xf32>
    %c0_116 = arith.constant 0 : index
    %c0_117 = arith.constant 0 : index
    %c0_118 = arith.constant 0 : index
    %144 = vector.load %arg33[%c0_116, %c0_117, %c0_118] : memref<1x1x2xf32, #tpu.memory_space<vmem>>, vector<1x1x2xf32>
    %145 = vector.shape_cast %144 : vector<1x1x2xf32> to vector<1x2xf32>
    %146 = vector.shape_cast %143 : vector<1x2xf32> to vector<1x1x2xf32>
    tpu.vector_store %arg33[%c0_116, %c0_117, %c0_118], %146 {strides = array<i32>} : memref<1x1x2xf32, #tpu.memory_space<vmem>>, vector<1x1x2xf32>,
    return
  }
  func.func @transform_0(%arg0: i32) -> (i32, i32, i32) {
    %c0_i32 = arith.constant 0 : i32
    %c0_i32_0 = arith.constant 0 : i32
    %c0_i32_1 = arith.constant 0 : i32
    return %arg0, %c0_i32, %c0_i32_0 : i32, i32, i32
  }
  func.func @transform_1(%arg0: i32) -> (i32, i32, i32) {
    %c0_i32 = arith.constant 0 : i32
    %c0_i32_0 = arith.constant 0 : i32
    %c0_i32_1 = arith.constant 0 : i32
    return %arg0, %c0_i32, %c0_i32_0 : i32, i32, i32
  }
  func.func @transform_2(%arg0: i32) -> (i32, i32) {
    %c0_i32 = arith.constant 0 : i32
    %c0_i32_0 = arith.constant 0 : i32
    %c0_i32_1 = arith.constant 0 : i32
    return %c0_i32, %c0_i32_0 : i32, i32
  }
  func.func @transform_3(%arg0: i32) -> (i32, i32) {
    %c0_i32 = arith.constant 0 : i32
    %c0_i32_0 = arith.constant 0 : i32
    %c0_i32_1 = arith.constant 0 : i32
    return %c0_i32, %c0_i32_0 : i32, i32
  }
  func.func @transform_4(%arg0: i32) -> (i32, i32) {
    %c0_i32 = arith.constant 0 : i32
    %c0_i32_0 = arith.constant 0 : i32
    %c0_i32_1 = arith.constant 0 : i32
    return %c0_i32, %c0_i32_0 : i32, i32
  }
  func.func @transform_5(%arg0: i32) -> (i32, i32) {
    %c0_i32 = arith.constant 0 : i32
    %c0_i32_0 = arith.constant 0 : i32
    %c0_i32_1 = arith.constant 0 : i32
    return %c0_i32, %c0_i32_0 : i32, i32
  }
  func.func @transform_6(%arg0: i32) -> (i32, i32) {
    %c0_i32 = arith.constant 0 : i32
    %c0_i32_0 = arith.constant 0 : i32
    %c0_i32_1 = arith.constant 0 : i32
    return %c0_i32, %c0_i32_0 : i32, i32
  }
  func.func @transform_7(%arg0: i32) -> (i32, i32) {
    %c0_i32 = arith.constant 0 : i32
    %c0_i32_0 = arith.constant 0 : i32
    %c0_i32_1 = arith.constant 0 : i32
    return %c0_i32, %c0_i32_0 : i32, i32
  }
  func.func @transform_8(%arg0: i32) -> (i32, i32) {
    %c0_i32 = arith.constant 0 : i32
    %c0_i32_0 = arith.constant 0 : i32
    %c0_i32_1 = arith.constant 0 : i32
    return %c0_i32, %c0_i32_0 : i32, i32
  }
  func.func @transform_9(%arg0: i32) -> (i32, i32) {
    %c0_i32 = arith.constant 0 : i32
    %c0_i32_0 = arith.constant 0 : i32
    %c0_i32_1 = arith.constant 0 : i32
    return %c0_i32, %c0_i32_0 : i32, i32
  }
  func.func @transform_10(%arg0: i32) -> (i32, i32) {
    %c0_i32 = arith.constant 0 : i32
    %c0_i32_0 = arith.constant 0 : i32
    %c0_i32_1 = arith.constant 0 : i32
    return %c0_i32, %c0_i32_0 : i32, i32
  }
  func.func @transform_11(%arg0: i32) -> (i32, i32) {
    %c0_i32 = arith.constant 0 : i32
    %c0_i32_0 = arith.constant 0 : i32
    %c0_i32_1 = arith.constant 0 : i32
    return %c0_i32, %c0_i32_0 : i32, i32
  }
  func.func @transform_12(%arg0: i32) -> (i32, i32) {
    %c0_i32 = arith.constant 0 : i32
    %c0_i32_0 = arith.constant 0 : i32
    %c0_i32_1 = arith.constant 0 : i32
    return %c0_i32, %c0_i32_0 : i32, i32
  }
  func.func @transform_13(%arg0: i32) -> (i32, i32) {
    %c0_i32 = arith.constant 0 : i32
    %c0_i32_0 = arith.constant 0 : i32
    %c0_i32_1 = arith.constant 0 : i32
    return %c0_i32, %c0_i32_0 : i32, i32
  }
  func.func @transform_14(%arg0: i32) -> (i32, i32) {
    %c0_i32 = arith.constant 0 : i32
    %c0_i32_0 = arith.constant 0 : i32
    %c0_i32_1 = arith.constant 0 : i32
    return %c0_i32, %c0_i32_0 : i32, i32
  }
  func.func @transform_15(%arg0: i32) -> (i32, i32) {
    %c0_i32 = arith.constant 0 : i32
    %c0_i32_0 = arith.constant 0 : i32
    %c0_i32_1 = arith.constant 0 : i32
    return %c0_i32, %c0_i32_0 : i32, i32
  }
  func.func @transform_16(%arg0: i32) -> (i32, i32) {
    %c0_i32 = arith.constant 0 : i32
    %c0_i32_0 = arith.constant 0 : i32
    %c0_i32_1 = arith.constant 0 : i32
    return %c0_i32, %c0_i32_0 : i32, i32
  }
  func.func @transform_17(%arg0: i32) -> (i32, i32) {
    %c0_i32 = arith.constant 0 : i32
    %c0_i32_0 = arith.constant 0 : i32
    %c0_i32_1 = arith.constant 0 : i32
    return %c0_i32, %c0_i32_0 : i32, i32
  }
  func.func @transform_18(%arg0: i32) -> (i32, i32) {
    %c0_i32 = arith.constant 0 : i32
    %c0_i32_0 = arith.constant 0 : i32
    %c0_i32_1 = arith.constant 0 : i32
    return %c0_i32, %c0_i32_0 : i32, i32
  }
  func.func @transform_19(%arg0: i32) -> (i32, i32) {
    %c0_i32 = arith.constant 0 : i32
    %c0_i32_0 = arith.constant 0 : i32
    %c0_i32_1 = arith.constant 0 : i32
    return %c0_i32, %c0_i32_0 : i32, i32
  }
  func.func @transform_20(%arg0: i32) -> (i32, i32) {
    %c0_i32 = arith.constant 0 : i32
    %c0_i32_0 = arith.constant 0 : i32
    %c0_i32_1 = arith.constant 0 : i32
    return %c0_i32, %c0_i32_0 : i32, i32
  }
  func.func @transform_21(%arg0: i32) -> (i32, i32) {
    %c0_i32 = arith.constant 0 : i32
    %c0_i32_0 = arith.constant 0 : i32
    %c0_i32_1 = arith.constant 0 : i32
    return %c0_i32, %c0_i32_0 : i32, i32
  }
  func.func @transform_22(%arg0: i32) -> (i32, i32, i32) {
    %c0_i32 = arith.constant 0 : i32
    %c0_i32_0 = arith.constant 0 : i32
    %c0_i32_1 = arith.constant 0 : i32
    %c0_i32_2 = arith.constant 0 : i32
    return %c0_i32, %c0_i32_0, %c0_i32_1 : i32, i32, i32
  }
  func.func @transform_23(%arg0: i32) -> (i32, i32, i32) {
    %c0_i32 = arith.constant 0 : i32
    %c0_i32_0 = arith.constant 0 : i32
    %c0_i32_1 = arith.constant 0 : i32
    %c0_i32_2 = arith.constant 0 : i32
    return %c0_i32, %c0_i32_0, %c0_i32_1 : i32, i32, i32
  }
  func.func @transform_24(%arg0: i32) -> (i32, i32, i32) {
    %c0_i32 = arith.constant 0 : i32
    %c0_i32_0 = arith.constant 0 : i32
    %c0_i32_1 = arith.constant 0 : i32
    %c0_i32_2 = arith.constant 0 : i32
    return %c0_i32, %c0_i32_0, %c0_i32_1 : i32, i32, i32
  }
  func.func @transform_25(%arg0: i32) -> (i32, i32, i32) {
    %c0_i32 = arith.constant 0 : i32
    %c0_i32_0 = arith.constant 0 : i32
    %c0_i32_1 = arith.constant 0 : i32
    %c0_i32_2 = arith.constant 0 : i32
    return %c0_i32, %c0_i32_0, %c0_i32_1 : i32, i32, i32
  }
  func.func @transform_26(%arg0: i32) -> (i32, i32) {
    %c0_i32 = arith.constant 0 : i32
    %c0_i32_0 = arith.constant 0 : i32
    %c0_i32_1 = arith.constant 0 : i32
    return %c0_i32, %c0_i32_0 : i32, i32
  }
  func.func @transform_27(%arg0: i32) -> (i32, i32) {
    %c0_i32 = arith.constant 0 : i32
    %c0_i32_0 = arith.constant 0 : i32
    %c0_i32_1 = arith.constant 0 : i32
    return %c0_i32, %c0_i32_0 : i32, i32
  }
  func.func @transform_28(%arg0: i32) -> (i32, i32) {
    %c0_i32 = arith.constant 0 : i32
    %c0_i32_0 = arith.constant 0 : i32
    %c0_i32_1 = arith.constant 0 : i32
    return %c0_i32, %c0_i32_0 : i32, i32
  }
  func.func @transform_29(%arg0: i32) -> (i32, i32) {
    %c0_i32 = arith.constant 0 : i32
    %c0_i32_0 = arith.constant 0 : i32
    %c0_i32_1 = arith.constant 0 : i32
    return %c0_i32, %c0_i32_0 : i32, i32
  }
  func.func @transform_30(%arg0: i32) -> (i32, i32) {
    %c0_i32 = arith.constant 0 : i32
    %c0_i32_0 = arith.constant 0 : i32
    %c0_i32_1 = arith.constant 0 : i32
    return %c0_i32, %c0_i32_0 : i32, i32
  }
  func.func @transform_31(%arg0: i32) -> (i32, i32) {
    %c0_i32 = arith.constant 0 : i32
    %c0_i32_0 = arith.constant 0 : i32
    %c0_i32_1 = arith.constant 0 : i32
    return %c0_i32, %c0_i32_0 : i32, i32
  }
  func.func @transform_32(%arg0: i32) -> (i32, i32, i32) {
    %c0_i32 = arith.constant 0 : i32
    %c0_i32_0 = arith.constant 0 : i32
    %c0_i32_1 = arith.constant 0 : i32
    return %arg0, %c0_i32, %c0_i32_0 : i32, i32, i32
  }
}

</mosaic_0001>

<bundles_post_ra>
// kernel: tpu_custom_call.1
= control target key start
LH: loop header
LB: loop body
LE: loop exit
PB: predicated region body
PF: predicated region fallthrough
CT: control target
= control target key end

     0   :  { %s4166_s6 = smov 1   ;;  %s4167_s10 = smov 2   ;;  %s4944_s0 = inlined_call_operand.smem [shape: u32[33], index: -1, kind: input, shape index: {}] }
   0x1   :  { %s4227_s5 = sld [smem:[%s4944_s0]]   ;;  %s4168_s14 = smov 3  }
   0x2   :  { %s4232_s9 = sld [smem:[%s4944_s0 + %s4166_s6]]   ;;  %s4169_s18 = smov 4  }
   0x3   :  { %s4237_s13 = sld [smem:[%s4944_s0 + %s4167_s10]]   ;;  %s4170_s22 = smov 5  }
   0x4   :  { %s4242_s17 = sld [smem:[%s4944_s0 + %s4168_s14]]   ;;  %s4171_s26 = smov 6  }
   0x5   :  { %s4247_s21 = sld [smem:[%s4944_s0 + %s4169_s18]]   ;;  %s4172_s30 = smov 7  }
   0x6   :  { %s2920_s25 = sld [smem:[%s4944_s0 + %s4170_s22]]   ;;  %s4173_s4 = smov 8  }
   0x7   :  { %4979 = sst [smem:[#allocation37_spill]] %s4227_s5  ;;  %s4174_s10 = smov 9  }
   0x8   :  { %4980 = sst [smem:[#allocation38_spill]] %s4232_s9  ;;  %s4175_s15 = smov 10  }
   0x9   :  { %4981 = sst [smem:[#allocation39_spill]] %s4237_s13  ;;  %s4176_s20 = smov 11  }
   0xa   :  { %s4255_s29 = sld [smem:[%s4944_s0 + %s4171_s26]]   ;;  %s4177_s26 = smov 12  }
   0xb   :  { %s4260_s3 = sld [smem:[%s4944_s0 + %s4172_s30]]   ;;  %s4178_s1 = smov 14  }
   0xc   :  { %s4265_s8 = sld [smem:[%s4944_s0 + %s4173_s4]]   ;;  %v70_v0 = vstv %s2920_s25  ;;  %s4179_s7 = smov 15  }
   0xd   :  { %s4270_s14 = sld [smem:[%s4944_s0 + %s4174_s10]]   ;;  %71 = vst [vmem:[#allocation2] sm:$0x1] %v70_v0  ;;  %s4180_s25 = smov 16  }
   0xe   :  { %s4275_s19 = sld [smem:[%s4944_s0 + %s4175_s15]]   ;;  %s4182_s27 = smov 18  }
   0xf   :  { %s4280_s24 = sld [smem:[%s4944_s0 + %s4176_s20]]   ;;  %s4181_s20 = smov 17  }
  0x10   :  { %4982 = sst [smem:[#allocation40_spill]] %s4255_s29  ;;  %s4183_s4 = smov 19  }
  0x11   :  { %4983 = sst [smem:[#allocation41_spill]] %s4260_s3 }
  0x12   :  { %4984 = sst [smem:[#allocation42_spill]] %s4265_s8 }
  0x13   :  { %4985 = sst [smem:[#allocation43_spill]] %s4270_s14 }
  0x14   :  { %4986 = sst [smem:[#allocation44_spill]] %s4275_s19 }
  0x15   :  { %s4285_s30 = sld [smem:[%s4944_s0 + %s4177_s26]]  }
  0x16   :  { %s4290_s6 = sld [smem:[%s4944_s0 + %s4178_s1]]  }
  0x17   :  { %s4295_s12 = sld [smem:[%s4944_s0 + %s4179_s7]]  }
  0x18   :  { %s4300_s18 = sld [smem:[%s4944_s0 + %s4180_s25]]   ;;  %s4184_s25 = smov 20  }
  0x19   :  { %s4305_s26 = sld [smem:[%s4944_s0 + %s4181_s20]]   ;;  %s4185_s20 = smov 21  }
  0x1a   :  { %s4310_s2 = sld [smem:[%s4944_s0 + %s4182_s27]]   ;;  %s4186_s27 = smov 22  }
  0x1b   :  { %s4315_s11 = sld [smem:[%s4944_s0 + %s4183_s4]]   ;;  %s4187_s4 = smov 23  }
  0x1c   :  { %4987 = sst [smem:[#allocation45_spill]] %s4290_s6 }
  0x1d   :  { %4988 = sst [smem:[#allocation46_spill]] %s4295_s12 }
  0x1e   :  { %4989 = sst [smem:[#allocation47_spill]] %s4300_s18 }
  0x1f   :  { %s4320_s18 = sld [smem:[%s4944_s0 + %s4184_s25]]   ;;  %s4188_s25 = smov 24  }
  0x20   :  { %4990 = sst [smem:[#allocation48_spill]] %s4310_s2 }
  0x21   :  { %4991 = sst [smem:[#allocation49_spill]] %s4315_s11 }
  0x22   :  { %s4325_s19 = sld [smem:[%s4944_s0 + %s4185_s20]]   ;;  %s4189_s20 = smov 25  }
  0x23   :  { %s4330_s2 = sld [smem:[%s4944_s0 + %s4186_s27]]   ;;  %s4190_s27 = smov 26  }
  0x24   :  { %s4335_s6 = sld [smem:[%s4944_s0 + %s4187_s4]]   ;;  %s4191_s4 = smov 27  }
  0x25   :  { %4992 = sst [smem:[#allocation50_spill]] %s4320_s18 }
  0x26   :  { %s4340_s18 = sld [smem:[%s4944_s0 + %s4188_s25]]   ;;  %s4192_s25 = smov 28  }
  0x27   :  { %s4345_s29 = sld [smem:[%s4944_s0 + %s4189_s20]]   ;;  %s4193_s20 = smov 29  }
  0x28   :  { %s4365_s9 = sld [smem:[%s4944_s0 + %s4193_s20]]   ;;  %s4197_s20 = smov 13  }
  0x29   :  { %4993 = sst [smem:[#allocation51_spill]] %s4330_s2 }
  0x2a   :  { %4994 = sst [smem:[#allocation52_spill]] %s4335_s6 }
  0x2b   :  { %s4350_s2 = sld [smem:[%s4944_s0 + %s4190_s27]]   ;;  %s4194_s27 = smov 30  }
  0x2c   :  { %4995 = sst [smem:[#allocation53_spill]] %s4340_s18 }
  0x2d   :  { %s4355_s6 = sld [smem:[%s4944_s0 + %s4191_s4]]   ;;  %s4195_s4 = smov 31  }
  0x2e   :  { %s4360_s18 = sld [smem:[%s4944_s0 + %s4192_s25]]   ;;  %s4196_s25 = smov 32  }
  0x2f   :  { %4999 = sst [smem:[#allocation57_spill]] %s4365_s9 }
  0x30   :  { %s4375_s8 = sld [smem:[%s4944_s0 + %s4195_s4]]  }
  0x31   :  { %4996 = sst [smem:[#allocation54_spill]] %s4350_s2 }
  0x32   :  { %s4370_s2 = sld [smem:[%s4944_s0 + %s4194_s27]]  }
  0x33   :  { %4997 = sst [smem:[#allocation55_spill]] %s4355_s6 }
  0x34   :  { %4998 = sst [smem:[#allocation56_spill]] %s4360_s18 }
  0x35   :  { %s4380_s18 = sld [smem:[%s4944_s0 + %s4196_s25]]  }
  0x36   :  { %5001 = sst [smem:[#allocation59_spill]] %s4375_s8 }
  0x37   :  { %s2928_s13 = sld [smem:[%s4944_s0 + %s4197_s20]]  }
  0x38   :  { %5000 = sst [smem:[#allocation58_spill]] %s4370_s2 }
  0x3b   :  { %5002 = sst [smem:[#allocation60_spill]] %s4380_s18 }
  0x3d   :  { %v72_v1 = vstv %s2928_s13 }
  0x3e   :  { %73 = vst [vmem:[#allocation3] sm:$0x1] %v72_v1 }
  0x3f   :  { %74 = vsyncpa [#allocation5], 0 }
  0x40   :  { %76 = vsyncpa [#allocation5 + $0x1], 0 }
  0x41   :  { %77 = vsyncpa [#allocation8], 0 }
  0x42   :  { %78 = vsyncpa [#allocation11], 0 }
  0x43   :  { %79 = vsyncpa [#allocation14], 0 }
  0x44   :  { %80 = vsyncpa [#allocation17], 0 }
  0x45   :  { %81 = vsyncpa [#allocation20], 0 }
  0x46   :  { %82 = vsyncpa [#allocation23], 0 }
  0x47   :  { %83 = vsyncpa [#allocation26], 0 }
  0x48   :  { %84 = vsyncpa [#allocation6], 0 }
  0x49   :  { %86 = vsyncpa [#allocation6 + $0x1], 0  ;;  %s4385_s27 = smov 0   ;;  %s4387_s28 = smov 0  }
  0x4a   :  { %s4389_s1 = smov 0   ;;  %s4391_s0 = smov 0  }
  0x4b LB: > { %s5003_s14 = sld [smem:[#allocation43_spill]]  ;;  %s5004_s2 = sld [smem:[#allocation58_spill]]  ;;  %s4164_s0 = sphi %s4391_s0, %s5057_s0   ;;  %s4160_s1 = sphi %s4389_s1, %s5056_s1   ;;  %s4156_s28 = sphi %s4387_s28, %s5055_s28   ;;  %s4152_s27 = sphi %s4385_s27, %s5054_s27  }
  0x4c   : > { %s5005_s5 = sld [smem:[#allocation37_spill]]  ;;  %s5006_s12 = sld [smem:[#allocation46_spill]] }
  0x4d   : > { %s5007_s9 = sld [smem:[#allocation57_spill]]  ;;  %s5008_s6 = sld [smem:[#allocation55_spill]] }
  0x4e   : > { %s5009_s11 = sld [smem:[#allocation49_spill]]  ;;  %s4198_s13 = smov [#allocation7]  }
  0x4f   : > { %s5010_s3 = sld [smem:[#allocation41_spill]]  ;;  %s821_s4 = sshll.u32 %s4198_s13, 4  ;;  %s4411_s4 = int_to_ptr.vmem [resolvable:$true] %s821_s4 }
  0x50   : > { %s4406_s7 = sadd.s32 4294967295, %s4164_s0   ;;  %p2950_p0 = scmp.ge.s32.totalorder %s4164_s0, 1 }
  0x51   : > { %p4959_p1 = scmp.eq.s32.totalorder %s4406_s7, 0  ;;  %p805_p2 = scmp.lt.s32.totalorder %s4164_s0, 3 }
  0x52   : > { %s4199_s25 = smov [#allocation10]   ;;  %s4200_s16 = smov [#allocation13]  }
  0x53   : > { %p4413_p3 = pnand %p2950_p0, %p805_p2  ;;  %s849_s15 = sshll.u32 %s4199_s25, 4  ;;  %s4420_s15 = int_to_ptr.vmem [resolvable:$true] %s849_s15 }
  0x54   : > { %s877_s20 = sshll.u32 %s4200_s16, 4  ;;  %s4201_s23 = smov [#allocation16]   ;;  %s4428_s20 = int_to_ptr.vmem [resolvable:$true] %s877_s20 }
  0x55   : > { %s5011_s10 = scalar_select %p4413_p3, 1, 0 }
  0x56   : > { %p3489_p5 = pneg %p4413_p3  ;;  %s4430_s13 = sshll.u32 %s4201_s23, 4  ;;  %s906_s13 = int_to_ptr.vmem [resolvable:$true] %s4430_s13 }
  0x57   : > { %s3676_s18 = scalar_lea.hbm %s4242_s17, 16 }
  0x58   : > { %p4424_p6 = pnand %p3489_p5, %p4959_p1  ;;  %p3677_p7 = scmp.ne.s32.totalorder %s4242_s17, %s3676_s18 }
  0x59   : > { %p3683_p11 = scmp.lt.u32.totalorder %s3676_s18, %s4242_s17 }
  0x5a   : > { %p4436_p8 = pneg %p4424_p6 }
  0x5c   : > { %p3679_p9 = pnand %p4436_p8, %p3677_p7 }
  0x5e   : > { %p3680_p10 = pneg %p3679_p9 }
  0x60   : > { %p3685_p12 = pnand %p3683_p11, %p3680_p10 }
  0x62   : > { %3688 = shalt.err (!%p3685_p12)
}
  0x63   : > { %s3689_s16 = scalar_lea.vmem %s4411_s4, 16  ;;  %s3696_s23 = scalar_lea.vmem %s4411_s4, 32 }
  0x64   : > { %p3690_p13 = scmp.ne.s32.totalorder %s4411_s4, %s3689_s16  ;;  %p3697_p5 = scmp.lt.s32.totalorder %s4411_s4, %s4411_s4 }
  0x65   : > { %p3698_p4 = scmp.lt.s32.totalorder %s3696_s23, %s3689_s16 }
  0x66   : > { %p3692_p0 = pnand %p3690_p13, %p4436_p8 }
  0x67   : > { %p3699_p1 = por %p3698_p4, %p3697_p5 }
  0x68   : > { %p3693_p2 = pneg %p3692_p0 }
  0x6a   : > { %p3700_p7 = pnand %p3699_p1, %p3693_p2 }
  0x6c   : > { %3703 = shalt.err (!%p3700_p7)
}
  0x6d   : > { %3492 = dma.hbm_to_vmem [thread:$0]  (!%p4424_p6), %s4242_s17, 16, %s4411_s4, [#allocation8]  }
  0x6e   : > { %s3704_s18 = scalar_lea.hbm %s5010_s3, 16 }
  0x6f   : > { %p3705_p9 = scmp.ne.s32.totalorder %s5010_s3, %s3704_s18  ;;  %p3711_p12 = scmp.lt.u32.totalorder %s3704_s18, %s5010_s3 }
  0x71   : > { %p3707_p10 = pnand %p3705_p9, %p4436_p8 }
  0x73   : > { %p3708_p11 = pneg %p3707_p10 }
  0x75   : > { %p3713_p13 = pnand %p3711_p12, %p3708_p11 }
  0x77   : > { %3716 = shalt.err (!%p3713_p13)
}
  0x78   : > { %s3717_s16 = scalar_lea.vmem %s4420_s15, 16  ;;  %s3724_s23 = scalar_lea.vmem %s4420_s15, 32 }
  0x79   : > { %p3718_p1 = scmp.ne.s32.totalorder %s4420_s15, %s3717_s16  ;;  %p3725_p2 = scmp.lt.s32.totalorder %s4420_s15, %s4420_s15 }
  0x7a   : > { %p3726_p5 = scmp.lt.s32.totalorder %s3724_s23, %s3717_s16 }
  0x7b   : > { %p3720_p4 = pnand %p3718_p1, %p4436_p8 }
  0x7c   : > { %p3727_p7 = por %p3726_p5, %p3725_p2 }
  0x7d   : > { %p3721_p0 = pneg %p3720_p4 }
  0x7f   : > { %p3728_p9 = pnand %p3727_p7, %p3721_p0 }
  0x81   : > { %3731 = shalt.err (!%p3728_p9)
}
  0x82   : > { %3498 = dma.hbm_to_vmem [thread:$0]  (!%p4424_p6), %s5010_s3, 16, %s4420_s15, [#allocation11]  }
  0x83   : > { %s3732_s4 = scalar_lea.hbm %s4280_s24, 16 }
  0x84   : > { %p3733_p10 = scmp.ne.s32.totalorder %s4280_s24, %s3732_s4  ;;  %p3739_p13 = scmp.lt.u32.totalorder %s3732_s4, %s4280_s24 }
  0x86   : > { %p3735_p11 = pnand %p3733_p10, %p4436_p8 }
  0x88   : > { %p3736_p12 = pneg %p3735_p11 }
  0x8a   : > { %p3741_p1 = pnand %p3739_p13, %p3736_p12 }
  0x8c   : > { %3744 = shalt.err (!%p3741_p1)
}
  0x8d   : > { %s3745_s18 = scalar_lea.vmem %s4428_s20, 16  ;;  %s3752_s16 = scalar_lea.vmem %s4428_s20, 32 }
  0x8e   : > { %p3746_p4 = scmp.ne.s32.totalorder %s4428_s20, %s3745_s18  ;;  %p3753_p5 = scmp.lt.s32.totalorder %s4428_s20, %s4428_s20 }
  0x8f   : > { %p3754_p7 = scmp.lt.s32.totalorder %s3752_s16, %s3745_s18 }
  0x90   : > { %p3748_p0 = pnand %p3746_p4, %p4436_p8 }
  0x91   : > { %p3755_p9 = por %p3754_p7, %p3753_p5 }
  0x92   : > { %p3749_p2 = pneg %p3748_p0 }
  0x94   : > { %p3756_p10 = pnand %p3755_p9, %p3749_p2 }
  0x96   : > { %3759 = shalt.err (!%p3756_p10)
}
  0x97   : > { %3504 = dma.hbm_to_vmem [thread:$0]  (!%p4424_p6), %s4280_s24, 16, %s4428_s20, [#allocation14]  }
  0x98   : > { %s4202_s15 = smov [#allocation19]   ;;  %s3760_s4 = scalar_lea.hbm %s5006_s12, 16 }
  0x99   : > { %s933_s23 = sshll.u32 %s4202_s15, 4  ;;  %p3761_p11 = scmp.ne.s32.totalorder %s5006_s12, %s3760_s4  ;;  %s934_s23 = int_to_ptr.vmem [resolvable:$true] %s933_s23 }
  0x9a   : > { %p3767_p1 = scmp.lt.u32.totalorder %s3760_s4, %s5006_s12 }
  0x9b   : > { %p3763_p12 = pnand %p3761_p11, %p4436_p8 }
  0x9d   : > { %p3764_p13 = pneg %p3763_p12 }
  0x9f   : > { %p3769_p4 = pnand %p3767_p1, %p3764_p13 }
  0xa1   : > { %3772 = shalt.err (!%p3769_p4)
}
  0xa2   : > { %s3773_s18 = scalar_lea.vmem %s906_s13, 16  ;;  %s3780_s16 = scalar_lea.vmem %s906_s13, 32 }
  0xa3   : > { %p3774_p0 = scmp.ne.s32.totalorder %s906_s13, %s3773_s18  ;;  %p3781_p7 = scmp.lt.s32.totalorder %s906_s13, %s906_s13 }
  0xa4   : > { %p3782_p9 = scmp.lt.s32.totalorder %s3780_s16, %s3773_s18 }
  0xa5   : > { %p3776_p2 = pnand %p3774_p0, %p4436_p8 }
  0xa6   : > { %p3783_p10 = por %p3782_p9, %p3781_p7 }
  0xa7   : > { %p3777_p5 = pneg %p3776_p2 }
  0xa9   : > { %p3784_p3 = pnand %p3783_p10, %p3777_p5 }
  0xab   : > { %3787 = shalt.err (!%p3784_p3)
}
  0xac   : > { %3510 = dma.hbm_to_vmem [thread:$0]  (!%p4424_p6), %s5006_s12, 16, %s906_s13, [#allocation17]  }
  0xad   : > { %s3788_s20 = scalar_lea.hbm %s5009_s11, 16 }
  0xae   : > { %p3789_p11 = scmp.ne.s32.totalorder %s5009_s11, %s3788_s20  ;;  %p3795_p1 = scmp.lt.u32.totalorder %s3788_s20, %s5009_s11 }
  0xb0   : > { %p3791_p12 = pnand %p3789_p11, %p4436_p8 }
  0xb2   : > { %p3792_p13 = pneg %p3791_p12 }
  0xb4   : > { %p3797_p4 = pnand %p3795_p1, %p3792_p13 }
  0xb6   : > { %3800 = shalt.err (!%p3797_p4)
}
  0xb7   : > { %s3801_s15 = scalar_lea.vmem %s934_s23, 16  ;;  %s3808_s4 = scalar_lea.vmem %s934_s23, 32 }
  0xb8   : > { %p3802_p3 = scmp.ne.s32.totalorder %s934_s23, %s3801_s15  ;;  %p3809_p5 = scmp.lt.s32.totalorder %s934_s23, %s934_s23 }
  0xb9   : > { %p3810_p7 = scmp.lt.s32.totalorder %s3808_s4, %s3801_s15 }
  0xba   : > { %p3804_p0 = pnand %p3802_p3, %p4436_p8 }
  0xbb   : > { %p3811_p9 = por %p3810_p7, %p3809_p5 }
  0xbc   : > { %p3805_p2 = pneg %p3804_p0 }
  0xbe   : > { %p3812_p10 = pnand %p3811_p9, %p3805_p2 }
  0xc0   : > { %3815 = shalt.err (!%p3812_p10)
}
  0xc1   : > { %3516 = dma.hbm_to_vmem [thread:$0]  (!%p4424_p6), %s5009_s11, 16, %s934_s23, [#allocation20]  }
  0xc2   : > { %s4203_s13 = smov [#allocation22]   ;;  %s3816_s16 = scalar_lea.hbm %s4345_s29, 48 }
  0xc3   : > { %s966_s18 = sshll.u32 %s4203_s13, 4  ;;  %p3817_p11 = scmp.ne.s32.totalorder %s4345_s29, %s3816_s16  ;;  %s967_s18 = int_to_ptr.vmem [resolvable:$true] %s966_s18 }
  0xc4   : > { %p3823_p1 = scmp.lt.u32.totalorder %s3816_s16, %s4345_s29 }
  0xc5   : > { %p3819_p12 = pnand %p3817_p11, %p4436_p8 }
  0xc7   : > { %p3820_p13 = pneg %p3819_p12 }
  0xc9   : > { %p3825_p4 = pnand %p3823_p1, %p3820_p13 }
  0xcb   : > { %3828 = shalt.err (!%p3825_p4)
}
  0xcc   : > { %s3829_s20 = scalar_lea.vmem %s967_s18, 48  ;;  %s3836_s15 = scalar_lea.vmem %s967_s18, 64 }
  0xcd   : > { %p3830_p3 = scmp.ne.s32.totalorder %s967_s18, %s3829_s20  ;;  %p3837_p5 = scmp.lt.s32.totalorder %s967_s18, %s967_s18 }
  0xce   : > { %p3838_p7 = scmp.lt.s32.totalorder %s3836_s15, %s3829_s20 }
  0xcf   : > { %p3832_p0 = pnand %p3830_p3, %p4436_p8 }
  0xd0   : > { %p3839_p9 = por %p3838_p7, %p3837_p5 }
  0xd1   : > { %p3833_p2 = pneg %p3832_p0 }
  0xd3   : > { %p3840_p10 = pnand %p3839_p9, %p3833_p2 }
  0xd5   : > { %3843 = shalt.err (!%p3840_p10)
}
  0xd6   : > { %s4204_s23 = smov 16   ;;  %s4205_s4 = smov 1  }
  0xd7   : > { %3522 = dma.hbm_to_vmem [thread:$0]  (!%p4424_p6), %s4345_s29, 48, %s967_s18, [#allocation23], %s4204_s23, %s4204_s23, %s4205_s4  }
  0xd8   : > { %s4206_s13 = smov [#allocation9]   ;;  %s4207_s3 = smov [#allocation12]  }
  0xd9   : > { %s832_s16 = sshll.u32 %s4206_s13, 4  ;;  %s863_s11 = sshll.u32 %s4207_s3, 4  ;;  %s833_s16 = int_to_ptr.vmem [resolvable:$true] %s832_s16  ;;  %s4517_s11 = int_to_ptr.vmem [resolvable:$true] %s863_s11 }
  0xda   : > { %s3844_s20 = scalar_lea.hbm %s4247_s21, 16 }
  0xdb   : > { %p3845_p11 = scmp.ne.s32.totalorder %s4247_s21, %s3844_s20  ;;  %p3851_p1 = scmp.lt.u32.totalorder %s3844_s20, %s4247_s21 }
  0xdd   : > { %p3847_p12 = pnand %p3845_p11, %p4436_p8 }
  0xdf   : > { %p3848_p13 = pneg %p3847_p12 }
  0xe1   : > { %p3853_p4 = pnand %p3851_p1, %p3848_p13 }
  0xe3   : > { %3856 = shalt.err (!%p3853_p4)
}
  0xe4   : > { %s3857_s15 = scalar_lea.vmem %s833_s16, 16  ;;  %s3864_s18 = scalar_lea.vmem %s833_s16, 32 }
  0xe5   : > { %p3858_p3 = scmp.ne.s32.totalorder %s833_s16, %s3857_s15  ;;  %p3865_p5 = scmp.lt.s32.totalorder %s833_s16, %s833_s16 }
  0xe6   : > { %p3866_p7 = scmp.lt.s32.totalorder %s3864_s18, %s3857_s15 }
  0xe7   : > { %p3860_p0 = pnand %p3858_p3, %p4436_p8 }
  0xe8   : > { %p3867_p9 = por %p3866_p7, %p3865_p5 }
  0xe9   : > { %p3861_p2 = pneg %p3860_p0 }
  0xeb   : > { %p3868_p10 = pnand %p3867_p9, %p3861_p2 }
  0xed   : > { %3871 = shalt.err (!%p3868_p10)
}
  0xee   : > { %3495 = dma.hbm_to_vmem [thread:$0]  (!%p4424_p6), %s4247_s21, 16, %s833_s16, [#allocation8]  }
  0xef   : > { %s3872_s3 = scalar_lea.hbm %s5003_s14, 16 }
  0xf0   : > { %p3873_p11 = scmp.ne.s32.totalorder %s5003_s14, %s3872_s3  ;;  %p3879_p1 = scmp.lt.u32.totalorder %s3872_s3, %s5003_s14 }
  0xf2   : > { %p3875_p12 = pnand %p3873_p11, %p4436_p8 }
  0xf4   : > { %p3876_p13 = pneg %p3875_p12 }
  0xf6   : > { %p3881_p4 = pnand %p3879_p1, %p3876_p13 }
  0xf8   : > { %3884 = shalt.err (!%p3881_p4)
}
  0xf9   : > { %s3885_s23 = scalar_lea.vmem %s4517_s11, 16  ;;  %s3892_s4 = scalar_lea.vmem %s4517_s11, 32 }
  0xfa   : > { %p3886_p3 = scmp.ne.s32.totalorder %s4517_s11, %s3885_s23  ;;  %p3893_p5 = scmp.lt.s32.totalorder %s4517_s11, %s4517_s11 }
  0xfb   : > { %p3894_p7 = scmp.lt.s32.totalorder %s3892_s4, %s3885_s23 }
  0xfc   : > { %p3888_p0 = pnand %p3886_p3, %p4436_p8 }
  0xfd   : > { %p3895_p9 = por %p3894_p7, %p3893_p5 }
  0xfe   : > { %p3889_p2 = pneg %p3888_p0 }
 0x100   : > { %p3896_p10 = pnand %p3895_p9, %p3889_p2 }
 0x102   : > { %3899 = shalt.err (!%p3896_p10)
}
 0x103   : > { %3501 = dma.hbm_to_vmem [thread:$0]  (!%p4424_p6), %s5003_s14, 16, %s4517_s11, [#allocation11]  }
 0x104   : > { %s4208_s13 = smov [#allocation15]   ;;  %s4209_s20 = smov [#allocation18]  }
 0x105   : > { %s888_s16 = sshll.u32 %s4208_s13, 4  ;;  %s919_s15 = sshll.u32 %s4209_s20, 4  ;;  %s889_s16 = int_to_ptr.vmem [resolvable:$true] %s888_s16  ;;  %s4545_s15 = int_to_ptr.vmem [resolvable:$true] %s919_s15 }
 0x106   : > { %s3900_s18 = scalar_lea.hbm %s4285_s30, 16 }
 0x107   : > { %p3901_p11 = scmp.ne.s32.totalorder %s4285_s30, %s3900_s18  ;;  %p3907_p1 = scmp.lt.u32.totalorder %s3900_s18, %s4285_s30 }
 0x109   : > { %p3903_p12 = pnand %p3901_p11, %p4436_p8 }
 0x10b   : > { %p3904_p13 = pneg %p3903_p12 }
 0x10d   : > { %p3909_p4 = pnand %p3907_p1, %p3904_p13 }
 0x10f   : > { %3912 = shalt.err (!%p3909_p4)
}
 0x110   : > { %s3913_s3 = scalar_lea.vmem %s889_s16, 16  ;;  %s3920_s11 = scalar_lea.vmem %s889_s16, 32 }
 0x111   : > { %p3914_p3 = scmp.ne.s32.totalorder %s889_s16, %s3913_s3  ;;  %p3921_p5 = scmp.lt.s32.totalorder %s889_s16, %s889_s16 }
 0x112   : > { %p3922_p7 = scmp.lt.s32.totalorder %s3920_s11, %s3913_s3 }
 0x113   : > { %p3916_p0 = pnand %p3914_p3, %p4436_p8 }
 0x114   : > { %p3923_p9 = por %p3922_p7, %p3921_p5 }
 0x115   : > { %p3917_p2 = pneg %p3916_p0 }
 0x117   : > { %p3924_p10 = pnand %p3923_p9, %p3917_p2 }
 0x119   : > { %3927 = shalt.err (!%p3924_p10)
}
 0x11a   : > { %3507 = dma.hbm_to_vmem [thread:$0]  (!%p4424_p6), %s4285_s30, 16, %s889_s16, [#allocation14]  }
 0x11b   : > { %s3928_s23 = scalar_lea.hbm %s4305_s26, 16 }
 0x11c   : > { %p3929_p11 = scmp.ne.s32.totalorder %s4305_s26, %s3928_s23  ;;  %p3935_p1 = scmp.lt.u32.totalorder %s3928_s23, %s4305_s26 }
 0x11e   : > { %p3931_p12 = pnand %p3929_p11, %p4436_p8 }
 0x120   : > { %p3932_p13 = pneg %p3931_p12 }
 0x122   : > { %p3937_p4 = pnand %p3935_p1, %p3932_p13 }
 0x124   : > { %3940 = shalt.err (!%p3937_p4)
}
 0x125   : > { %s3941_s4 = scalar_lea.vmem %s4545_s15, 16  ;;  %s3948_s13 = scalar_lea.vmem %s4545_s15, 32 }
 0x126   : > { %p3942_p3 = scmp.ne.s32.totalorder %s4545_s15, %s3941_s4  ;;  %p3949_p5 = scmp.lt.s32.totalorder %s4545_s15, %s4545_s15 }
 0x127   : > { %p3950_p7 = scmp.lt.s32.totalorder %s3948_s13, %s3941_s4 }
 0x128   : > { %p3944_p0 = pnand %p3942_p3, %p4436_p8 }
 0x129   : > { %p3951_p9 = por %p3950_p7, %p3949_p5 }
 0x12a   : > { %p3945_p2 = pneg %p3944_p0 }
 0x12c   : > { %p3952_p10 = pnand %p3951_p9, %p3945_p2 }
 0x12e   : > { %3955 = shalt.err (!%p3952_p10)
}
 0x12f   : > { %3513 = dma.hbm_to_vmem [thread:$0]  (!%p4424_p6), %s4305_s26, 16, %s4545_s15, [#allocation17]  }
 0x130   : > { %s4210_s16 = smov [#allocation21]   ;;  %s4211_s18 = smov [#allocation24]  }
 0x131   : > { %s947_s20 = sshll.u32 %s4210_s16, 4  ;;  %s983_s3 = sshll.u32 %s4211_s18, 4  ;;  %s948_s20 = int_to_ptr.vmem [resolvable:$true] %s947_s20  ;;  %s4573_s3 = int_to_ptr.vmem [resolvable:$true] %s983_s3 }
 0x132   : > { %s3956_s11 = scalar_lea.hbm %s4325_s19, 16 }
 0x133   : > { %p3957_p11 = scmp.ne.s32.totalorder %s4325_s19, %s3956_s11  ;;  %p3963_p1 = scmp.lt.u32.totalorder %s3956_s11, %s4325_s19 }
 0x135   : > { %p3959_p12 = pnand %p3957_p11, %p4436_p8 }
 0x137   : > { %p3960_p13 = pneg %p3959_p12 }
 0x139   : > { %p3965_p4 = pnand %p3963_p1, %p3960_p13 }
 0x13b   : > { %3968 = shalt.err (!%p3965_p4)
}
 0x13c   : > { %s3969_s23 = scalar_lea.vmem %s948_s20, 16  ;;  %s3976_s15 = scalar_lea.vmem %s948_s20, 32 }
 0x13d   : > { %p3970_p3 = scmp.ne.s32.totalorder %s948_s20, %s3969_s23  ;;  %p3977_p5 = scmp.lt.s32.totalorder %s948_s20, %s948_s20 }
 0x13e   : > { %p3978_p7 = scmp.lt.s32.totalorder %s3976_s15, %s3969_s23 }
 0x13f   : > { %p3972_p0 = pnand %p3970_p3, %p4436_p8 }
 0x140   : > { %p3979_p9 = por %p3978_p7, %p3977_p5 }
 0x141   : > { %p3973_p2 = pneg %p3972_p0 }
 0x143   : > { %p3980_p10 = pnand %p3979_p9, %p3973_p2 }
 0x145   : > { %3983 = shalt.err (!%p3980_p10)
}
 0x146   : > { %3519 = dma.hbm_to_vmem [thread:$0]  (!%p4424_p6), %s4325_s19, 16, %s948_s20, [#allocation20]  }
 0x147   : > { %s3984_s4 = scalar_lea.hbm %s5008_s6, 16 }
 0x148   : > { %p3985_p11 = scmp.ne.s32.totalorder %s5008_s6, %s3984_s4  ;;  %p3991_p1 = scmp.lt.u32.totalorder %s3984_s4, %s5008_s6 }
 0x14a   : > { %p3987_p12 = pnand %p3985_p11, %p4436_p8 }
 0x14c   : > { %p3988_p13 = pneg %p3987_p12 }
 0x14e   : > { %p3993_p4 = pnand %p3991_p1, %p3988_p13 }
 0x150   : > { %3996 = shalt.err (!%p3993_p4)
}
 0x151   : > { %s3997_s13 = scalar_lea.vmem %s4573_s3, 16  ;;  %s4004_s16 = scalar_lea.vmem %s4573_s3, 32 }
 0x152   : > { %p3998_p3 = scmp.ne.s32.totalorder %s4573_s3, %s3997_s13  ;;  %p4005_p5 = scmp.lt.s32.totalorder %s4573_s3, %s4573_s3 }
 0x153   : > { %p4006_p7 = scmp.lt.s32.totalorder %s4004_s16, %s3997_s13 }
 0x154   : > { %p4000_p0 = pnand %p3998_p3, %p4436_p8 }
 0x155   : > { %p4007_p9 = por %p4006_p7, %p4005_p5 }
 0x156   : > { %p4001_p2 = pneg %p4000_p0 }
 0x158   : > { %p4008_p10 = pnand %p4007_p9, %p4001_p2 }
 0x15a   : > { %4011 = shalt.err (!%p4008_p10)
}
 0x15b   : > { %3525 = dma.hbm_to_vmem [thread:$0]  (!%p4424_p6), %s5008_s6, 16, %s4573_s3, [#allocation23]  }
 0x15c   : > { %s4212_s20 = smov [#allocation25]   ;;  %s4012_s11 = scalar_lea.hbm %s5007_s9, 16 }
 0x15d   : > { %s997_s18 = sshll.u32 %s4212_s20, 4  ;;  %p4013_p11 = scmp.ne.s32.totalorder %s5007_s9, %s4012_s11  ;;  %s998_s18 = int_to_ptr.vmem [resolvable:$true] %s997_s18 }
 0x15e   : > { %p4019_p1 = scmp.lt.u32.totalorder %s4012_s11, %s5007_s9 }
 0x15f   : > { %p4015_p12 = pnand %p4013_p11, %p4436_p8 }
 0x161   : > { %p4016_p13 = pneg %p4015_p12 }
 0x163   : > { %p4021_p4 = pnand %p4019_p1, %p4016_p13 }
 0x165   : > { %4024 = shalt.err (!%p4021_p4)
}
 0x166   : > { %s4025_s23 = scalar_lea.vmem %s998_s18, 16  ;;  %s4032_s15 = scalar_lea.vmem %s998_s18, 32 }
 0x167   : > { %p4026_p3 = scmp.ne.s32.totalorder %s998_s18, %s4025_s23  ;;  %p4033_p5 = scmp.lt.s32.totalorder %s998_s18, %s998_s18 }
 0x168   : > { %p4034_p7 = scmp.lt.s32.totalorder %s4032_s15, %s4025_s23 }
 0x169   : > { %p4028_p0 = pnand %p4026_p3, %p4436_p8 }
 0x16a   : > { %p4035_p9 = por %p4034_p7, %p4033_p5 }
 0x16b   : > { %p4029_p2 = pneg %p4028_p0 }
 0x16d   : > { %p4036_p10 = pnand %p4035_p9, %p4029_p2 }
 0x16f   : > { %4039 = shalt.err (!%p4036_p10)
}
 0x170   : > { %3528 = dma.hbm_to_vmem [thread:$0]  (!%p4424_p6), %s5007_s9, 16, %s998_s18, [#allocation26]  }
 0x171   : > { %s2949_s25 = sadd.s32 4294967294, %s4164_s0   ;;  %s4613_s3 = sadd.s32 1, %s4164_s0  }
 0x172   : > { %s99_s22 = sadd.s32 1, %s4160_s1  ;;  %s96_s4 = ssub.s32 %s4164_s0, %s4613_s3 }
 0x173   : > { %p106_p8 = scmp.ne.s32.totalorder %s4160_s1, %s4156_s28  ;;  %p97_p11 = scmp.eq.s32.totalorder %s96_s4, 0 }
 0x174   : > { %p107_p12 = scmp.eq.s32.totalorder %s4164_s0, 0  ;;  %p112_p13 = scmp.ne.s32.totalorder %s4156_s28, %s4152_s27 }
 0x175   : > { %p792_p1 = scmp.eq.s32.totalorder %s4406_s7, 1  ;;  %p5014_p3 = scmp.eq.s32.totalorder %s4406_s7, 0 }
 0x176   : > { %s4625_s13 = scalar_select %p97_p11, %s4160_s1, %s99_s22  }
 0x177   : > { %p108_p4 = por %p107_p12, %p106_p8  ;;  %p4629_p0 = por %p5014_p3, %p112_p13 }
 0x178   : > { %p4633_p6 = por %p792_p1, %p106_p8  ;;  %p798_p2 = scmp.eq.s32.totalorder %s2949_s25, 1 }
 0x179   : > { %s5015_s16 = scalar_select %p4629_p0, 1, 0 }
 0x17a   : > { %s5016_s20 = scalar_select %p4633_p6, 1, 0 }
 0x17b   : > { %p3550_p5 = scmp.lt.s32.totalorder %s4164_s0, 2  ;;  %s1014_s18 = sand.u32 1, %s4160_s1  }
 0x17c   : > { %p4639_p7 = por %p798_p2, %p112_p13  ;;  %s2965_s23 = sshll.u32 %s1014_s18, 3 }
 0x17d   : > { %s2966_s15 = sshll.u32 %s4164_s0, 7  ;;  %s1018_s4 = scalar_lea.vmem [#allocation4], %s2965_s23 }
 0x17e   : > { %s5017_s11 = scalar_select %p4639_p7, 1, 0 }
 0x17f   : > { %s4645_s22 = scalar_lea.hbm %s5005_s5, %s2966_s15  ;;  %s1025_s6 = sshll.u32 %s1018_s4, 4  ;;  %s4651_s6 = int_to_ptr.vmem [resolvable:$true] %s1025_s6 }
 0x180   : > { %p4647_p9 = pnand %p3550_p5, %p108_p4  ;;  %s1015_s9 = scalar_lea.sflag [#allocation5], %s1014_s18 }
 0x181   : > { %s4040_s12 = scalar_lea.hbm %s4645_s22, 128  ;;  %s4045_s15 = scalar_lea.hbm %s5005_s5, 256 }
 0x182   : > { %p4041_p10 = scmp.ne.s32.totalorder %s4645_s22, %s4040_s12  ;;  %p4042_p8 = pneg %p4647_p9 }
 0x183   : > { %p4046_p13 = scmp.lt.u32.totalorder %s4645_s22, %s5005_s5  ;;  %p4047_p1 = scmp.lt.u32.totalorder %s4045_s15, %s4040_s12 }
 0x184   : > { %p4043_p11 = pnand %p4042_p8, %p4041_p10  ;;  %p4049_p3 = scmp.lt.u32.totalorder %s4040_s12, %s4645_s22 }
 0x185   : > { %p4048_p4 = por %p4047_p1, %p4046_p13 }
 0x186   : > { %p4044_p12 = pneg %p4043_p11 }
 0x187   : > { %p4050_p2 = por %p4049_p3, %p4048_p4 }
 0x189   : > { %p4051_p5 = pnand %p4050_p2, %p4044_p12 }
 0x18b   : > { %4054 = shalt.err (!%p4051_p5)
}
 0x18c   : > { %s4055_s18 = scalar_lea.vmem %s4651_s6, 128  ;;  %s4213_s23 = smov [#allocation4]  }
 0x18d   : > { %p4056_p7 = scmp.ne.s32.totalorder %s4651_s6, %s4055_s18  ;;  %s4060_s4 = sshll.u32 %s4213_s23, 4  ;;  %s4061_s4 = int_to_ptr.vmem [resolvable:$false] %s4060_s4 }
 0x18e   : > { %s4062_s5 = scalar_lea.vmem %s4061_s4, 256  ;;  %p4063_p10 = scmp.lt.s32.totalorder %s4651_s6, %s4061_s4 }
 0x18f   : > { %p4058_p6 = pnand %p4056_p7, %p4042_p8  ;;  %p4064_p11 = scmp.lt.s32.totalorder %s4062_s5, %s4055_s18 }
 0x191   : > { %p4059_p0 = pneg %p4058_p6  ;;  %p4065_p13 = por %p4064_p11, %p4063_p10 }
 0x193   : > { %p4066_p1 = pnand %p4065_p13, %p4059_p0 }
 0x195   : > { %4069 = shalt.err (!%p4066_p1)
}
 0x196   : > { %3532 = dma.hbm_to_vmem [thread:$0]  (!%p4647_p9), %s4645_s22, 128, %s4651_s6, %s1015_s9  }
 0x197   : > { %p5019_p12 = scmp.ne.s32.totalorder %s5011_s10, 0 }
 0x198   : > { %s4677_s12 = sand.u32 (!%p5019_p12), 1, %s4156_s28   ;;  %p5020_p0 = scmp.ne.s32.totalorder (!%p5019_p12), %s5015_s16, 0 }
 0x199   : > { %1042 = sbr.rel (%p5019_p12) target bundleno = 3180 (0xc6c), region = 148  ;;  %s2968_s15 = sshll.u32 (!%p5019_p12), %s4677_s12, 3 }
 0x19a   : > { %s1045_s23 = scalar_lea.sflag (!%p5019_p12), [#allocation5], %s4677_s12  ;;  %s4681_s5 = scalar_lea.vmem (!%p5019_p12), [#allocation4], %s2968_s15 }
 0x1a0   : > { %4115 = dma.done.wait (%p5020_p0), %s1045_s23, 128  }
 0x1a1   : > { %4117 = vsyncadd (%p5020_p0), %s1045_s23, 4294967168  ;;  %p5021_p6 = scmp.eq.s32.totalorder %s4406_s7, 0 }
 0x1a3   : > { %4119 = dma.done.wait (%p5021_p6), [#allocation8], 32   ;;  %p5022_p7 = pmov %p5021_p6 }
 0x1a4   : > { %p5023_p9 = pmov %p5021_p6 }
 0x1a5   : > { %4121 = vsyncadd (%p5022_p7), [#allocation8], 4294967264 }
 0x1a6   : > { %4123 = dma.done.wait (%p5023_p9), [#allocation11], 32   ;;  %p5024_p8 = pmov %p5021_p6 }
 0x1a7   : > { %p5025_p4 = pmov %p5021_p6 }
 0x1a8   : > { %4125 = vsyncadd (%p5024_p8), [#allocation11], 4294967264 }
 0x1a9   : > { %4127 = dma.done.wait (%p5025_p4), [#allocation14], 32   ;;  %p5026_p3 = pmov %p5025_p4 }
 0x1ab   : > { %4129 = vsyncadd (%p5026_p3), [#allocation14], 4294967264  ;;  %p5027_p2 = pmov %p5026_p3 }
 0x1ad   : > { %4131 = dma.done.wait (%p5027_p2), [#allocation17], 32   ;;  %p5028_p5 = pmov %p5027_p2 }
 0x1ae   : > { %p5029_p10 = pmov %p5027_p2 }
 0x1af   : > { %4133 = vsyncadd (%p5028_p5), [#allocation17], 4294967264 }
 0x1b0   : > { %4135 = dma.done.wait (%p5029_p10), [#allocation20], 32   ;;  %p5030_p11 = pmov %p5027_p2 }
 0x1b1   : > { %p5031_p13 = pmov %p5027_p2 }
 0x1b2   : > { %4137 = vsyncadd (%p5030_p11), [#allocation20], 4294967264 }
 0x1b3   : > { %4139 = dma.done.wait (%p5031_p13), [#allocation23], 64   ;;  %p5032_p1 = pmov %p5027_p2 }
 0x1b5   : > { %4141 = vsyncadd (%p5032_p1), [#allocation23], 4294967232  ;;  %p5033_p12 = pmov %p5032_p1 }
 0x1b6   : > { %p5034_p0 = pmov %p5032_p1 }
 0x1b7   : > { %4143 = dma.done.wait (%p5033_p12), [#allocation26], 16  }
 0x1b8   : > { %4145 = vsyncadd (%p5034_p0), [#allocation26], 4294967280  ;;  %s5035_s9 = sld [smem:[#allocation39_spill]]  ;;  %v4214_v2 = vmov 0.0|0.0   ;;  %vm4215_vm0 = vmmov 0   ;;  %v4216_v3 = vmov 0.0  }
 0x1b9   : > { %3321 = vmatprep.subr.bf16.mxu0 %v4214_v2  ;;  %3132 = vmatprep.mubr.msk.f32.mxu0 %vm4215_vm0, %v4216_v3  ;;  %v4727_v10 = vld [vmem:[%s4681_s5] sm:$0xff]  ;;  %vm1204_vm1 = vcmask 261120   ;;  %s5036_s6 = sld [smem:[#allocation42_spill]]  ;;  %v2984_v11 = vld [vmem:[#allocation7] ss:$0 sm:$0xff]  ;;  %vm1287_vm2 = vcmask 195584  }
 0x1ba   : > { %3327 = vmatprep.subr.bf16.mxu1 %v4214_v2  ;;  %3143 = vmatprep.mubr.msk.f32.mxu1 %vm4215_vm0, %v4216_v3  ;;  %v2986_v15 = vld [vmem:[#allocation9] ss:$0 sm:$0xff]  ;;  %v4217_v19 = vmov 0   ;;  %v2987_v23 = vld [vmem:[#allocation2] ss:$0 sm:$0xff]  ;;  %vm1299_vm3 = vcmask 7168  }
 0x1bb   : > { %3648 = vset.pattern.permute.xlu0 %v4217_v19  ;;  %3649 = vset.pattern.permute.xlu1 %v4217_v19  ;;  %s5037_s10 = sld [smem:[#allocation38_spill]]  ;;  %s5038_s16 = sld [smem:[#allocation40_spill]]  ;;  %vm1522_vm4 = vcmask 326656   ;;  %vm1840_vm5 = vcmask 392192   ;;  %vm2626_vm6 = vcmask 130048   ;;  %vm2700_vm7 = vcmask 8192  }
 0x1bc   : > { %s5039_s22 = sld [smem:[#allocation45_spill]]  ;;  %p1185_p6 = scmp.lt.s32.totalorder %s4406_s7, 1 }
 0x1bd   : > { %s5040_s15 = sld [smem:[#allocation44_spill]]  ;;  %s5041_s23 = sld [smem:[#allocation47_spill]] }
 0x1be   : > { %v1193_v4 = vld [vmem:[%s5035_s9] sm:$0xff]  ;;  %v1194_v5 = vld [vmem:[%s5035_s9 + $0x8] sm:$0xff]  ;;  %v1195_v6 = vld [vmem:[%s5035_s9 + $0x10] sm:$0xff]  ;;  %s1186_s25 = scalar_select %p1185_p6, %s4406_s7, 1 }
 0x1bf   : > { %v3322_v7 = vpack.c.bf16 %v1194_v5, %v1193_v4  ;;  %v1196_v8 = vld [vmem:[%s5035_s9 + $0x18] sm:$0xff]  ;;  %v1410_v20 = vld [vmem:[%s5036_s6] sm:$0xff]  ;;  %v1411_v21 = vld [vmem:[%s5036_s6 + $0x8] sm:$0xff]  ;;  %s5042_s5 = sld [smem:[#allocation50_spill]]  ;;  %s5049_s8 = sld [smem:[#allocation59_spill]] }
 0x1c0   : > { %v3325_v9 = vpack.c.bf16 %v1196_v8, %v1195_v6  ;;  %v3333_v22 = vpack.c.bf16 %v1411_v21, %v1410_v20  ;;  %v1412_v45 = vld [vmem:[%s5036_s6 + $0x10] sm:$0xff]  ;;  %v1413_v46 = vld [vmem:[%s5036_s6 + $0x18] sm:$0xff]  ;;  %s3031_s18 = sshll.u32 %s1186_s25, 4  ;;  %s5044_s25 = sld [smem:[#allocation53_spill]] }
 0x1c1   : > { %3323 = vmatpush3.bf16.msra.mxu0 %v3322_v7  ;;  %v3337_v47 = vpack.c.bf16 %v1413_v46, %v1412_v45  ;;  %s1189_s4 = scalar_lea.vmem %s5037_s10, %s3031_s18  ;;  %v1332_v48 = vld [vmem:[%s5038_s16] sm:$0xff]  ;;  %v1333_v49 = vld [vmem:[%s5038_s16 + $0x8] sm:$0xff]  ;;  %v1334_v56 = vld [vmem:[%s5038_s16 + $0x10] sm:$0xff]  ;;  %s5043_s10 = sld [smem:[#allocation48_spill]] }
 0x1c2   : > { %3324 = vmatprep.subr.bf16.mxu0 %v4214_v2  ;;  %v1678_v50 = vld [vmem:[%s5039_s22] sm:$0xff]  ;;  %v3328_v52 = vpack.c.bf16 %v1333_v49, %v1332_v48  ;;  %v1679_v53 = vld [vmem:[%s5039_s22 + $0x8] sm:$0xff]  ;;  %v1335_v57 = vld [vmem:[%s5038_s16 + $0x18] sm:$0xff]  ;;  %s5045_s18 = sld [smem:[#allocation51_spill]]  ;;  %s5048_s6 = sld [smem:[#allocation52_spill]] }
 0x1c3   : > { %v4745_v51 = vld [vmem:[%s1189_s4] sm:$0xff]  ;;  %v4748_v54 = vld [vmem:[%s1189_s4 + $0x8] sm:$0xff]  ;;  %v3350_v55 = vpack.c.bf16 %v1679_v53, %v1678_v50  ;;  %v1680_v58 = vld [vmem:[%s5039_s22 + $0x10] sm:$0xff]  ;;  %v3331_v59 = vpack.c.bf16 %v1335_v57, %v1334_v56  ;;  %s5046_s4 = sld [smem:[#allocation54_spill]]  ;;  %p5051_p9 = scmp.ne.s32.totalorder %s5016_s20, 0 }
 0x1c4   : > { %3329 = vmatpush3.bf16.msra.mxu1 %v3328_v52  ;;  %v1681_v60 = vld [vmem:[%s5039_s22 + $0x18] sm:$0xff]  ;;  %v1336_v21 = vld [vmem:[#allocation10] sm:$0x1] }
 0x1c5   : > { %3326 = vmatpush3.bf16.msra.mxu0 %v3325_v9  ;;  %3330 = vmatprep.subr.bf16.mxu1 %v4214_v2  ;;  %v3353_v61 = vpack.c.bf16 %v1681_v60, %v1680_v58  ;;  %v2989_v20 = vld [vmem:[#allocation12] ss:$0 sm:$0xff] }
 0x1c6   : > { %3334 = vmatprep.subr.bf16.mxu0 %v3333_v22 }
 0x1c8   : > { %3133 = vmatmul.mubr.msk.f32.vlgmr.msra.gmra.mrb[0].mxu0 %vm1204_vm1, %v4727_v10  ;;  %3332 = vmatpush3.bf16.msra.mxu1 %v3331_v59 }
 0x1c9   : > { %3336 = vmatpush3.bf16.msra.mxu0 %v3333_v22  ;;  %3154 = vmatprep.mubr.msk.f32.mxu0 %vm1204_vm1, %v4745_v51 }
 0x1ca   : > { %3338 = vmatprep.subr.bf16.mxu0 %v3337_v47 }
 0x1cd   : > { %3340 = vmatpush3.bf16.msra.mxu0 %v3337_v47  ;;  %v2996_v47 = vld [vmem:[#allocation3] ss:$0 sm:$0xff] }
 0x1ce   : > { %3349 = vmatprep.subr.bf16.mxu0 %v4214_v2 }
 0x1d0   : > { %3155 = vmatmul.mubr.msk.f32.vlgmr.msra.gmra.mrb[2].mxu0 %vm1204_vm1, %v4748_v54 }
 0x1d1   : > { %3351 = vmatpush3.bf16.msra.mxu0 %v3350_v55  ;;  %3178 = vmatprep.mubr.msk.f32.mxu0 %vm4215_vm0, %v4216_v3 }
 0x1d2   : > { %3352 = vmatprep.subr.bf16.mxu0 %v4214_v2 }
 0x1d5   : > { %3354 = vmatpush3.bf16.msra.mxu0 %v3353_v61 }
 0x1d6   : > { %3361 = vmatprep.subr.bf16.mxu0 %v4214_v2 }
 0x29b   : > { %v1274_v12 = vpop.f32.mrb[0].mxu0 }
 0x29c   : > { %v1275_v13 = vadd.f32 %v2984_v11, %v1274_v12  ;;  %v3134_v14 = vpop.f32.mrb[1].mxu0  ;;  %v1510_v11 = vld [vmem:[%s5040_s15] sm:$0xff]  ;;  %v1511_v12 = vld [vmem:[%s5040_s15 + $0x8] sm:$0xff] }
 0x29d   : > { %v1512_v14 = vld [vmem:[%s5040_s15 + $0x10] sm:$0xff] }
 0x29e   : > { %3650 = vtanh.f32 %v1275_v13  ;;  %v3341_v13 = vpack.c.bf16 %v1511_v12, %v1510_v11 }
 0x2a0   : > { %3342 = vmatprep.subr.bf16.mxu1 %v3341_v13 }
 0x2a3   : > { %v3156_v9 = vpop.f32.mrb[2].mxu0 }
 0x2a8   : > { %v3651_v16 = vpop.eup %3650 }
 0x2a9   : > { %v1286_v17 = vmul.f32 %v3651_v16, %v2986_v15  ;;  %v1513_v15 = vld [vmem:[%s5040_s15 + $0x18] sm:$0xff] }
 0x2aa   : > { %v3345_v16 = vpack.c.bf16 %v1513_v15, %v1512_v14 }
 0x2ab   : > { %v1288_v18 = vsel %vm1287_vm2, %v1286_v17, 0.0  ;;  %v1514_v17 = vld [vmem:[%s5040_s15 + $0x20] sm:$0xff] }
 0x2ac   : > { %1289 = vadd.xlane.f32.xlu0 %v1288_v18  ;;  %v1502_v18 = vlaneseq }
 0x2ae   : > { %v1503_v19 = vshrl.u32 %v1502_v18, 7 }
 0x2b0   : > { %v1504_v22 = vsub.s32 0, %v1503_v19  ;;  %v1754_v19 = vld [vmem:[%s5041_s23] sm:$0xff] }
 0x339   : > { %v1290_v24 = vpop.xlane.xlu0 %1289 }
 0x33a   : > { %v1298_v25 = vadd.f32 %v2987_v23, %v1290_v24 }
 0x33c   : > { %v1300_v26 = vsel %vm1299_vm3, %v1298_v25, -inf }
 0x33d   : > { %v1301_v27 = vrot.slane %v1300_v26, 4 }
 0x33f   : > { %v1302_v28 = vmax.f32 %v1300_v26, %v1301_v27 }
 0x341   : > { %v1303_v29 = vrot.slane %v1302_v28, 2 }
 0x343   : > { %v1304_v30 = vmax.f32 %v1302_v28, %v1303_v29 }
 0x345   : > { %v1305_v31 = vrot.slane %v1304_v30, 1 }
 0x347   : > { %v1306_v32 = vmax.f32 %v1304_v30, %v1305_v31 }
 0x349   : > { %v1307_v33 = vsub.f32 %v1298_v25, %v1306_v32  ;;  %v1499_v25 = vadd.f32 %v3156_v9, %v2989_v20 }
 0x34b   : > { %v1308_v34 = vmul.f32 1.442695, %v1307_v33 }
 0x34d   : > { %3652 = vpow2.f32 %v1308_v34 }
 0x357   : > { %v3653_v35 = vpop.eup %3652 }
 0x358   : > { %v1310_v36 = vsel %vm1299_vm3, %v3653_v35, 0.0 }
 0x359   : > { %v1311_v37 = vrot.slane %v1310_v36, 4 }
 0x35b   : > { %v1312_v38 = vadd.f32 %v1311_v37, %v1310_v36 }
 0x35d   : > { %v1313_v39 = vrot.slane %v1312_v38, 2 }
 0x35f   : > { %v1314_v40 = vadd.f32 %v1313_v39, %v1312_v38 }
 0x361   : > { %v1315_v41 = vrot.slane %v1314_v40, 1 }
 0x363   : > { %v1316_v42 = vadd.f32 %v1315_v41, %v1314_v40  ;;  %v2995_v40 = vld [vmem:[#allocation15] ss:$0 sm:$0xff] }
 0x365   : > { %3654 = vrcp.f32 %v1316_v42 }
 0x36f   : > { %v3655_v43 = vpop.eup %3654 }
 0x370   : > { %v1318_v44 = vmul.f32 %v3655_v43, %v3653_v35  ;;  %v2992_v35 = vld [vmem:[#allocation13] ss:$0 sm:$0xff] }
 0x372   : > { %1321 = vperm.xlu0 %3648, %v1318_v44  }
 0x3f1   : > { %v1322_v62 = vpop.permute.xlu0 %1321 }
 0x3f2   : > { %v1324_v63 = vmul.f32 %v1322_v62, %v4727_v10  ;;  %v1493_v10 = vpop.f32.mrb[3].mxu0 }
 0x3f3   : > { %v1494_v26 = vadd.f32 %v2989_v20, %v1493_v10  ;;  %v1755_v20 = vld [vmem:[%s5041_s23 + $0x8] sm:$0xff] }
 0x3f4   : > { %v1325_v0 = vsel %vm1204_vm1, %v1324_v63, 0.0 }
 0x3f5   : > { %v1326_v1 = vrot.slane %v1325_v0, 4 }
 0x3f7   : > { %v1327_v4 = vadd.f32 %v1326_v1, %v1325_v0 }
 0x3f9   : > { %v1328_v5 = vrot.slane %v1327_v4, 2 }
 0x3fb   : > { %v1329_v6 = vadd.f32 %v1328_v5, %v1327_v4 }
 0x3fd   : > { %v1330_v7 = vrot.slane %v1329_v6, 1 }
 0x3ff   : > { %v1331_v8 = vadd.f32 %v1330_v7, %v1329_v6 }
 0x401   : > { %3144 = vmatmul.mubr.msk.f32.vlgmr.msra.gmra.mrb[0].mxu1 %vm1204_vm1, %v1331_v8  ;;  %3179 = vmatmul.mubr.msk.f32.vlgmr.msra.gmra.mrb[4].mxu0 %vm1204_vm1, %v1331_v8 }
 0x402   : > { %3204 = vmatprep.mubr.msk.f32.mxu0 %vm4215_vm0, %v4216_v3  ;;  %3344 = vmatpush3.bf16.msra.mxu1 %v3341_v13 }
 0x403   : > { %3346 = vmatprep.subr.bf16.mxu1 %v3345_v16 }
 0x406   : > { %3348 = vmatpush3.bf16.msra.mxu1 %v3345_v16 }
 0x407   : > { %3165 = vmatprep.subr.mxu1 %v1514_v17 }
 0x40a   : > { %3166 = vmatpush3.msra.mxu1 %v1514_v17 }
 0x40b   : > { %3355 = vmatprep.subr.bf16.mxu1 %v4214_v2 }
 0x4d4   : > { %v1406_v23 = vpop.f32.mrb[0].mxu1  ;;  %v4775_v24 = vpop.f32.mrb[4].mxu0 }
 0x4d5   : > { %v1407_v27 = vadd.f32 %v1406_v23, %v1336_v21  ;;  %v3145_v28 = vpop.f32.mrb[1].mxu1  ;;  %v3180_v29 = vpop.f32.mrb[5].mxu0  ;;  %v3356_v21 = vpack.c.bf16 %v1755_v20, %v1754_v19  ;;  %v1757_v23 = vld [vmem:[%s5041_s23 + $0x18] sm:$0xff]  ;;  %v3011_v20 = vld [vmem:[%s5044_s25 + $0x30] sm:$0xff] }
 0x4d7   : > { %v1505_v30 = vrot.slane %v1407_v27, %v1504_v22  ;;  %v1756_v22 = vld [vmem:[%s5041_s23 + $0x10] sm:$0xff] }
 0x4d9   : > { %v1506_v31 = vmul.f32 %v1505_v30, %v1494_v26  ;;  %v1507_v32 = vmul.f32 %v1505_v30, %v1499_v25  ;;  %v3359_v25 = vpack.c.bf16 %v1757_v23, %v1756_v22 }
 0x4db   : > { %3656 = vtanh.f32 %v1506_v31 }
 0x4dc   : > { %3658 = vtanh.f32 %v1507_v32 }
 0x4e5   : > { %v3657_v33 = vpop.eup %3656 }
 0x4e6   : > { %v3659_v34 = vpop.eup %3658  ;;  %3167 = vmatprep.mubr.msk.f32.mxu1 %vm1522_vm4, %v3657_v33 }
 0x4e7   : > { %3168 = vmatmul.mubr.msk.f32.vlgmr.msra.gmra.mrb[2].mxu1 %vm1522_vm4, %v3659_v34 }
 0x4e8   : > { %3189 = vmatprep.mubr.msk.f32.mxu1 %vm4215_vm0, %v4216_v3  ;;  %3357 = vmatpush3.bf16.msra.mxu1 %v3356_v21  ;;  %v3012_v21 = vld [vmem:[%s5044_s25 + $0x38] sm:$0xff] }
 0x4e9   : > { %3358 = vmatprep.subr.bf16.mxu1 %v4214_v2  ;;  %v3401_v23 = vpack.c.bf16 %v3012_v21, %v3011_v20 }
 0x4ec   : > { %3360 = vmatpush3.bf16.msra.mxu1 %v3359_v25  ;;  %v3020_v25 = vld [vmem:[%s5044_s25 + $0x40] sm:$0xff] }
 0x4ed   : > { %3370 = vmatprep.subr.bf16.mxu1 %v4214_v2 }
 0x5ba   : > { %v3169_v36 = vpop.f32.mrb[2].mxu1 }
 0x5bb   : > { %v1601_v37 = vadd.f32 %v3169_v36, %v2992_v35  ;;  %v1595_v38 = vpop.f32.mrb[3].mxu1  ;;  %v1682_v36 = vld [vmem:[#allocation16] sm:$0x1] }
 0x5bc   : > { %v1596_v39 = vadd.f32 %v2992_v35, %v1595_v38  ;;  %v1914_v38 = vld [vmem:[%s5042_s5] sm:$0xff] }
 0x5bd   : > { %3660 = vtanh.f32 %v1601_v37 }
 0x5be   : > { %3662 = vtanh.f32 %v1596_v39  ;;  %v1915_v39 = vld [vmem:[%s5042_s5 + $0x8] sm:$0xff] }
 0x5c7   : > { %v3661_v41 = vpop.eup %3660 }
 0x5c8   : > { %v3663_v42 = vpop.eup %3662  ;;  %v1614_v45 = vmul.f32 %v3661_v41, %v2995_v40  ;;  %v3371_v41 = vpack.c.bf16 %v1915_v39, %v1914_v38  ;;  %v3005_v39 = vld [vmem:[%s5045_s18 + $0x30] sm:$0xff] }
 0x5c9   : > { %v1613_v43 = vmul.f32 %v3663_v42, %v2995_v40  ;;  %v1750_v40 = vadd.f32 %v4775_v24, %v1682_v36  ;;  %v1916_v42 = vld [vmem:[%s5042_s5 + $0x10] sm:$0xff]  ;;  %v1919_v24 = vld [vmem:[%s5042_s5 + $0x28] sm:$0xff] }
 0x5ca   : > { %v1618_v46 = vsel %vm1287_vm2, %v1614_v45, 0.0  ;;  %v1918_v45 = vld [vmem:[%s5042_s5 + $0x20] sm:$0xff] }
 0x5cb   : > { %v1615_v44 = vsel %vm1287_vm2, %v1613_v43, 0.0  ;;  %v1917_v43 = vld [vmem:[%s5042_s5 + $0x18] sm:$0xff]  ;;  %s5047_s5 = sld [smem:[#allocation56_spill]] }
 0x5cc   : > { %1616 = vadd.xlane.f32.xlu1 %v1615_v44  ;;  %v3374_v44 = vpack.c.bf16 %v1917_v43, %v1916_v42  ;;  %v3015_v42 = vld [vmem:[%s5045_s18 + $0x48] sm:$0xff] }
 0x5d0   : > { %1619 = vadd.xlane.f32.xlu1 %v1618_v46  ;;  %v3377_v46 = vpack.c.bf16 %v1919_v24, %v1918_v45  ;;  %v3016_v45 = vld [vmem:[%s5045_s18 + $0x50] sm:$0xff]  ;;  %v3017_v24 = vld [vmem:[%s5045_s18 + $0x58] sm:$0xff] }
 0x659   : > { %v1617_v48 = vpop.xlane.xlu1 %1616 }
 0x65a   : > { %v1628_v49 = vadd.f32 %v2996_v47, %v1617_v48  ;;  %v1833_v48 = vld [vmem:[%s5043_s10] sm:$0xff] }
 0x65c   : > { %v1630_v53 = vsel %vm1299_vm3, %v1628_v49, -inf }
 0x65d   : > { %v1620_v50 = vpop.xlane.xlu1 %1619 }
 0x65e   : > { %v1629_v52 = vadd.f32 %v2996_v47, %v1620_v50 }
 0x660   : > { %v1631_v55 = vsel %vm1299_vm3, %v1629_v52, -inf }
 0x661   : > { %v1632_v56 = vmax.f32 %v1630_v53, %v1631_v55  ;;  %v2073_v53 = vld [vmem:[%s5044_s25 + $0x8] sm:$0xff]  ;;  %v1835_v55 = vld [vmem:[%s5043_s10 + $0x10] sm:$0xff] }
 0x663   : > { %v1633_v57 = vrot.slane %v1632_v56, 4 }
 0x665   : > { %v1634_v58 = vmax.f32 %v1632_v56, %v1633_v57  ;;  %v1836_v57 = vld [vmem:[%s5043_s10 + $0x18] sm:$0xff] }
 0x667   : > { %v1635_v59 = vrot.slane %v1634_v58, 2 }
 0x669   : > { %v1636_v60 = vmax.f32 %v1634_v58, %v1635_v59  ;;  %v2074_v58 = vld [vmem:[%s5044_s25 + $0x10] sm:$0xff]  ;;  %v2075_v59 = vld [vmem:[%s5044_s25 + $0x18] sm:$0xff] }
 0x66b   : > { %v1637_v61 = vrot.slane %v1636_v60, 1 }
 0x66d   : > { %v1638_v62 = vmax.f32 %v1636_v60, %v1637_v61  ;;  %v3365_v60 = vpack.c.bf16 %v1836_v57, %v1835_v55  ;;  %v1837_v61 = vld [vmem:[%s5043_s10 + $0x20] sm:$0xff]  ;;  %v2466_v55 = vld [vmem:[%s5046_s4 + $0x10] sm:$0xff] }
 0x66f   : > { %v1639_v63 = vsub.f32 %v1628_v49, %v1638_v62  ;;  %v1640_v0 = vsub.f32 %v1629_v52, %v1638_v62  ;;  %v1834_v49 = vld [vmem:[%s5043_s10 + $0x8] sm:$0xff]  ;;  %v2072_v52 = vld [vmem:[%s5044_s25] sm:$0xff] }
 0x670   : > { %v3362_v50 = vpack.c.bf16 %v1834_v49, %v1833_v48  ;;  %v3386_v56 = vpack.c.bf16 %v2073_v53, %v2072_v52  ;;  %v1838_v62 = vld [vmem:[%s5043_s10 + $0x28] sm:$0xff]  ;;  %s2703_s10 = scalar_lea.sflag [#allocation6], %s4677_s12 }
 0x671   : > { %v1641_v1 = vmul.f32 1.442695, %v1639_v63  ;;  %v1643_v4 = vmul.f32 1.442695, %v1640_v0  ;;  %v3389_v63 = vpack.c.bf16 %v2075_v59, %v2074_v58  ;;  %v3368_v0 = vpack.c.bf16 %v1838_v62, %v1837_v61  ;;  %v2465_v52 = vld [vmem:[%s5046_s4 + $0x8] sm:$0xff]  ;;  %v2542_v58 = vld [vmem:[%s5047_s5] sm:$0xff] }
 0x672   : > { %3363 = vmatpush3.bf16.msra.mxu0 %v3362_v50  ;;  %v2464_v50 = vld [vmem:[%s5046_s4] sm:$0xff]  ;;  %v2543_v59 = vld [vmem:[%s5047_s5 + $0x8] sm:$0xff]  ;;  %v2545_v62 = vld [vmem:[%s5047_s5 + $0x18] sm:$0xff] }
 0x673   : > { %3664 = vpow2.f32 %v1641_v1  ;;  %3364 = vmatprep.subr.bf16.mxu0 %v4214_v2  ;;  %v1758_v1 = vld [vmem:[#allocation18] sm:$0x1]  ;;  %v3416_v53 = vpack.c.bf16 %v2465_v52, %v2464_v50  ;;  %v3422_v61 = vpack.c.bf16 %v2543_v59, %v2542_v58 }
 0x674   : > { %3666 = vpow2.f32 %v1643_v4 }
 0x676   : > { %3366 = vmatpush3.bf16.msra.mxu0 %v3365_v60  ;;  %v2544_v60 = vld [vmem:[%s5047_s5 + $0x10] sm:$0xff] }
 0x677   : > { %3367 = vmatprep.subr.bf16.mxu0 %v4214_v2 }
 0x67a   : > { %3369 = vmatpush3.bf16.msra.mxu0 %v3368_v0  ;;  %v2076_v0 = vld [vmem:[#allocation22] sm:$0x1] }
 0x67b   : > { %3379 = vmatprep.subr.bf16.mxu0 %v4214_v2 }
 0x67d   : > { %v3665_v5 = vpop.eup %3664 }
 0x67e   : > { %v3667_v6 = vpop.eup %3666  ;;  %v1645_v7 = vsel %vm1299_vm3, %v3665_v5, 0.0 }
 0x67f   : > { %v1646_v8 = vsel %vm1299_vm3, %v3667_v6, 0.0 }
 0x680   : > { %v1647_v9 = vadd.f32 %v1646_v8, %v1645_v7  ;;  %v1994_v7 = vld [vmem:[%s5045_s18] sm:$0xff]  ;;  %v1995_v8 = vld [vmem:[%s5045_s18 + $0x8] sm:$0xff] }
 0x682   : > { %v1648_v10 = vrot.slane %v1647_v9, 4 }
 0x684   : > { %v1649_v11 = vadd.f32 %v1648_v10, %v1647_v9  ;;  %v3009_v9 = vld [vmem:[%s5044_s25 + $0x20] sm:$0xff]  ;;  %v3010_v10 = vld [vmem:[%s5044_s25 + $0x28] sm:$0xff] }
 0x686   : > { %v1650_v12 = vrot.slane %v1649_v11, 2 }
 0x688   : > { %v1651_v13 = vadd.f32 %v1650_v12, %v1649_v11  ;;  %v1920_v11 = vld [vmem:[#allocation21] sm:$0x1]  ;;  %v3380_v12 = vpack.c.bf16 %v1995_v8, %v1994_v7 }
 0x68a   : > { %v1652_v14 = vrot.slane %v1651_v13, 1 }
 0x68c   : > { %v1653_v15 = vadd.f32 %v1652_v14, %v1651_v13  ;;  %v3398_v14 = vpack.c.bf16 %v3010_v10, %v3009_v9  ;;  %v2235_v9 = vld [vmem:[#allocation22 + $0x1] sm:$0x1]  ;;  %v3007_v10 = vld [vmem:[%s5048_s6 + $0x1] sm:$0x1] }
 0x68e   : > { %3668 = vrcp.f32 %v1653_v15  ;;  %v1996_v15 = vld [vmem:[%s5045_s18 + $0x10] sm:$0xff] }
 0x68f   : > { %3670 = vtanh.f32 %v1750_v40 }
 0x698   : > { %v3669_v16 = vpop.eup %3668 }
 0x699   : > { %v1655_v17 = vmul.f32 %v3669_v16, %v3665_v5  ;;  %v1656_v18 = vmul.f32 %v3669_v16, %v3667_v6  ;;  %v3671_v47 = vpop.eup %3670  ;;  %v1997_v16 = vld [vmem:[%s5045_s18 + $0x18] sm:$0xff] }
 0x69a   : > { %v3383_v22 = vpack.c.bf16 %v1997_v16, %v1996_v15 }
 0x69b   : > { %1659 = vperm.xlu1 %3649, %v1655_v17  }
 0x69f   : > { %1664 = vperm.xlu1 %3649, %v1656_v18  }
 0x71a   : > { %v1660_v26 = vpop.permute.xlu1 %1659 }
 0x71b   : > { %v1667_v27 = vmul.f32 %v1660_v26, %v4745_v51  ;;  %v3021_v26 = vld [vmem:[%s5044_s25 + $0x48] sm:$0xff] }
 0x71d   : > { %v1669_v30 = vsel %vm1204_vm1, %v1667_v27, 0.0  ;;  %v3410_v27 = vpack.c.bf16 %v3021_v26, %v3020_v25  ;;  %v2546_v25 = vld [vmem:[%s5047_s5 + $0x20] sm:$0xff]  ;;  %v2547_v26 = vld [vmem:[%s5047_s5 + $0x28] sm:$0xff]  ;;  %s3028_s5 = sshll.u32 %s4406_s7, 4  ;;  %s4218_s7 = smov [#allocation27]  }
 0x71e   : > { %v1665_v28 = vpop.permute.xlu1 %1664 }
 0x71f   : > { %v1668_v29 = vmul.f32 %v1665_v28, %v4748_v54  ;;  %v3022_v28 = vld [vmem:[%s5044_s25 + $0x50] sm:$0xff] }
 0x721   : > { %v1670_v31 = vsel %vm1204_vm1, %v1668_v29, 0.0  ;;  %v3023_v29 = vld [vmem:[%s5044_s25 + $0x58] sm:$0xff] }
 0x722   : > { %v1671_v32 = vadd.f32 %v1670_v31, %v1669_v30  ;;  %v3413_v30 = vpack.c.bf16 %v3023_v29, %v3022_v28  ;;  %v3003_v31 = vld [vmem:[%s5045_s18 + $0x20] sm:$0xff]  ;;  %v2468_v28 = vld [vmem:[#allocation24] sm:$0x1] }
 0x724   : > { %v1672_v33 = vrot.slane %v1671_v32, 4 }
 0x726   : > { %v1673_v34 = vadd.f32 %v1672_v33, %v1671_v32  ;;  %v3004_v32 = vld [vmem:[%s5045_s18 + $0x28] sm:$0xff]  ;;  %v1839_v33 = vld [vmem:[#allocation19] sm:$0x1] }
 0x728   : > { %v1674_v35 = vrot.slane %v1673_v34, 2 }
 0x72a   : > { %v1675_v37 = vadd.f32 %v1674_v35, %v1673_v34  ;;  %v3392_v35 = vpack.c.bf16 %v3004_v32, %v3003_v31  ;;  %v2623_v32 = vld [vmem:[%s5004_s2] sm:$0xff] }
 0x72c   : > { %v1676_v51 = vrot.slane %v1675_v37, 1 }
 0x72e   : > { %v1677_v54 = vadd.f32 %v1676_v51, %v1675_v37  ;;  %v3006_v51 = vld [vmem:[%s5045_s18 + $0x38] sm:$0xff] }
 0x730   : > { %3190 = vmatmul.mubr.msk.f32.vlgmr.msra.gmra.mrb[4].mxu1 %vm1204_vm1, %v1677_v54  ;;  %v3014_v54 = vld [vmem:[%s5045_s18 + $0x40] sm:$0xff] }
 0x731   : > { %3372 = vmatpush3.bf16.msra.mxu1 %v3371_v41  ;;  %3219 = vmatprep.mubr.msk.f32.mxu1 %vm4215_vm0, %v4216_v3  ;;  %v3395_v41 = vpack.c.bf16 %v3006_v51, %v3005_v39  ;;  %v3404_v43 = vpack.c.bf16 %v3015_v42, %v3014_v54  ;;  %v2625_v39 = vld [vmem:[%s5049_s8] sm:$0x1]  ;;  %s4074_s8 = sshll.u32 %s4218_s7, 4  ;;  %s4075_s8 = int_to_ptr.vmem [resolvable:$false] %s4074_s8 }
 0x732   : > { %3373 = vmatprep.subr.bf16.mxu1 %v4214_v2  ;;  %s4076_s15 = scalar_lea.vmem %s4075_s8, 32 }
 0x735   : > { %3375 = vmatpush3.bf16.msra.mxu1 %v3374_v44 }
 0x736   : > { %3376 = vmatprep.subr.bf16.mxu1 %v4214_v2 }
 0x739   : > { %3378 = vmatpush3.bf16.msra.mxu1 %v3377_v46 }
 0x73a   : > { %3385 = vmatprep.subr.bf16.mxu1 %v4214_v2 }
 0x73c   : > { %3220 = vmatmul.mubr.msk.f32.vlgmr.msra.gmra.mrb[6].mxu1 %vm1840_vm5, %v3671_v47  ;;  %v3407_v47 = vpack.c.bf16 %v3017_v24, %v3016_v45 }
 0x73d   : > { %3241 = vmatprep.mubr.msk.f32.mxu1 %vm4215_vm0, %v4216_v3  ;;  %3387 = vmatpush3.bf16.msra.mxu1 %v3386_v56  ;;  %v2467_v56 = vld [vmem:[%s5046_s4 + $0x18] sm:$0xff]  ;;  %s5050_s4 = sld [smem:[#allocation60_spill]] }
 0x73e   : > { %3388 = vmatprep.subr.bf16.mxu1 %v4214_v2  ;;  %v3419_v57 = vpack.c.bf16 %v2467_v56, %v2466_v55 }
 0x741   : > { %3390 = vmatpush3.bf16.msra.mxu1 %v3389_v63  ;;  %v3425_v63 = vpack.c.bf16 %v2545_v62, %v2544_v60 }
 0x742   : > { %3397 = vmatprep.subr.bf16.mxu1 %v4214_v2 }
 0x803   : > { %v1828_v4 = vpop.f32.mrb[4].mxu1 }
 0x804   : > { %v1829_v5 = vadd.f32 %v1828_v4, %v1758_v1  ;;  %v3191_v6 = vpop.f32.mrb[5].mxu1  ;;  %v1998_v1 = vld [vmem:[%s5048_s6] sm:$0x1] }
 0x806   : > { %3672 = vtanh.f32 %v1829_v5 }
 0x80f   : > { %v1990_v13 = vpop.f32.mrb[6].mxu1 }
 0x810   : > { %v3673_v17 = vpop.eup %3672  ;;  %v1991_v18 = vadd.f32 %v1990_v13, %v1920_v11  ;;  %v3221_v19 = vpop.f32.mrb[7].mxu1 }
 0x811   : > { %3205 = vmatmul.mubr.msk.f32.vlgmr.msra.gmra.mrb[6].mxu0 %vm1840_vm5, %v3673_v17  ;;  %v2391_v17 = vld [vmem:[#allocation22 + $0x2] sm:$0x1] }
 0x812   : > { %3242 = vmatmul.mubr.msk.f32.vlgmr.msra.gmra.mrb[8].mxu1 %vm1204_vm1, %v1991_v18  ;;  %3381 = vmatpush3.bf16.msra.mxu0 %v3380_v12 }
 0x813   : > { %3399 = vmatpush3.bf16.msra.mxu1 %v3398_v14  ;;  %3263 = vmatprep.mubr.msk.f32.mxu1 %vm4215_vm0, %v4216_v3 }
 0x814   : > { %3400 = vmatprep.subr.bf16.mxu1 %v4214_v2  ;;  %3382 = vmatprep.subr.bf16.mxu0 %v4214_v2 }
 0x815   : > { %3230 = vmatprep.mubr.msk.f32.mxu0 %vm4215_vm0, %v4216_v3 }
 0x816   : > { %3384 = vmatpush3.bf16.msra.mxu0 %v3383_v22 }
 0x817   : > { %3402 = vmatpush3.bf16.msra.mxu1 %v3401_v23  ;;  %3391 = vmatprep.subr.bf16.mxu0 %v4214_v2 }
 0x818   : > { %3409 = vmatprep.subr.bf16.mxu1 %v4214_v2 }
 0x81a   : > { %3264 = vmatmul.mubr.msk.f32.vlgmr.msra.gmra.mrb[10].mxu1 %vm1204_vm1, %v1991_v18 }
 0x81b   : > { %3411 = vmatpush3.bf16.msra.mxu1 %v3410_v27  ;;  %3285 = vmatprep.mubr.msk.f32.mxu1 %vm4215_vm0, %v4216_v3  ;;  %v3428_v27 = vpack.c.bf16 %v2547_v26, %v2546_v25 }
 0x81c   : > { %3412 = vmatprep.subr.bf16.mxu1 %v4214_v2 }
 0x81f   : > { %3414 = vmatpush3.bf16.msra.mxu1 %v3413_v30 }
 0x820   : > { %3421 = vmatprep.subr.bf16.mxu1 %v4214_v2 }
 0x822   : > { %3286 = vmatmul.mubr.msk.f32.vlgmr.msra.gmra.mrb[12].mxu1 %vm1204_vm1, %v1991_v18 }
 0x823   : > { %3311 = vmatprep.mubr.msk.f32.mxu1 %vm4215_vm0, %v4216_v3  ;;  %3423 = vmatpush3.bf16.msra.mxu1 %v3422_v61 }
 0x824   : > { %3424 = vmatprep.subr.bf16.mxu1 %v4214_v2 }
 0x827   : > { %3426 = vmatpush3.bf16.msra.mxu1 %v3425_v63 }
 0x828   : > { %3427 = vmatprep.subr.bf16.mxu1 %v4214_v2 }
 0x82b   : > { %3429 = vmatpush3.bf16.msra.mxu1 %v3428_v27 }
 0x8e4   : > { %v1910_v34 = vpop.f32.mrb[6].mxu0 }
 0x8e5   : > { %v1911_v36 = vadd.f32 %v1910_v34, %v1839_v33  ;;  %v2146_v37 = vpop.f32.mrb[8].mxu1  ;;  %v3206_v38 = vpop.f32.mrb[7].mxu0  ;;  %v2624_v33 = vld [vmem:[%s5004_s2 + $0x8] sm:$0xff]  ;;  %s4904_s2 = scalar_lea.hbm %s5050_s4, %s3028_s5 }
 0x8e6   : > { %v3243_v40 = vpop.f32.mrb[9].mxu1  ;;  %v2147_v5 = vadd.f32 %v2146_v37, %v2076_v0  ;;  %v3431_v34 = vpack.c.bf16 %v2624_v33, %v2623_v32 }
 0x8e7   : > { %3231 = vmatmul.mubr.msk.f32.vlgmr.msra.gmra.mrb[8].mxu0 %vm1204_vm1, %v1911_v36 }
 0x8e8   : > { %3393 = vmatpush3.bf16.msra.mxu0 %v3392_v35  ;;  %3252 = vmatprep.mubr.msk.f32.mxu0 %vm4215_vm0, %v4216_v3  ;;  %v2548_v35 = vld [vmem:[#allocation25] sm:$0x1] }
 0x8e9   : > { %3394 = vmatprep.subr.bf16.mxu0 %v4214_v2 }
 0x8ec   : > { %3396 = vmatpush3.bf16.msra.mxu0 %v3395_v41 }
 0x8ed   : > { %v2302_v44 = vpop.f32.mrb[10].mxu1  ;;  %3403 = vmatprep.subr.bf16.mxu0 %v4214_v2 }
 0x8ee   : > { %v3265_v46 = vpop.f32.mrb[11].mxu1  ;;  %v2303_v12 = vadd.f32 %v2302_v44, %v2235_v9 }
 0x8ef   : > { %3253 = vmatmul.mubr.msk.f32.vlgmr.msra.gmra.mrb[10].mxu0 %vm1204_vm1, %v1911_v36 }
 0x8f0   : > { %3405 = vmatpush3.bf16.msra.mxu0 %v3404_v43  ;;  %3274 = vmatprep.mubr.msk.f32.mxu0 %vm4215_vm0, %v4216_v3 }
 0x8f1   : > { %3406 = vmatprep.subr.bf16.mxu0 %v4214_v2 }
 0x8f4   : > { %3408 = vmatpush3.bf16.msra.mxu0 %v3407_v47 }
 0x8f5   : > { %v2458_v48 = vpop.f32.mrb[12].mxu1  ;;  %3415 = vmatprep.subr.bf16.mxu0 %v4214_v2 }
 0x8f6   : > { %v3287_v49 = vpop.f32.mrb[13].mxu1  ;;  %v2459_v19 = vadd.f32 %v2458_v48, %v2391_v17 }
 0x8f7   : > { %3275 = vmatmul.mubr.msk.f32.vlgmr.msra.gmra.mrb[12].mxu0 %vm1204_vm1, %v1911_v36 }
 0x8f8   : > { %3296 = vmatprep.mubr.msk.f32.mxu0 %vm4215_vm0, %v4216_v3  ;;  %3417 = vmatpush3.bf16.msra.mxu0 %v3416_v53 }
 0x8f9   : > { %3418 = vmatprep.subr.bf16.mxu0 %v4214_v2 }
 0x8fc   : > { %3420 = vmatpush3.bf16.msra.mxu0 %v3419_v57 }
 0x8fd   : > { %3430 = vmatprep.subr.bf16.mxu0 %v4214_v2  ;;  %v3018_v2 = vld [vmem:[%s5048_s6 + $0x2] sm:$0x1]  ;;  %s1184_s6 = scalar_lea.vmem [#allocation27], %s4677_s12 }
 0x8fe   : > { %s2715_s9 = sshll.u32 %s1184_s6, 4  ;;  %s4906_s9 = int_to_ptr.vmem [resolvable:$true] %s2715_s9 }
 0x8ff   : > { %s4070_s14 = scalar_lea.vmem %s4906_s9, 16  ;;  %p4077_p3 = scmp.lt.s32.totalorder %s4906_s9, %s4075_s8 }
 0x900   : > { %p4071_p7 = scmp.ne.s32.totalorder %s4906_s9, %s4070_s14  ;;  %p4078_p2 = scmp.lt.s32.totalorder %s4076_s15, %s4070_s14 }
 0x902   : > { %p4072_p8 = pnand %p4071_p7, %p5051_p9  ;;  %p4079_p5 = por %p4078_p2, %p4077_p3 }
 0x904   : > { %p4073_p4 = pneg %p4072_p8 }
 0x906   : > { %p4080_p10 = pnand %p4079_p5, %p4073_p4 }
 0x9ba   : > { %v2068_v4 = vpop.f32.mrb[8].mxu0 }
 0x9bb   : > { %v2069_v6 = vadd.f32 %v2068_v4, %v1998_v1  ;;  %v3232_v7 = vpop.f32.mrb[9].mxu0 }
 0x9bd   : > { %v2150_v8 = vmul.f32 %v2147_v5, %v2069_v6 }
 0x9c2   : > { %v2225_v11 = vpop.f32.mrb[10].mxu0 }
 0x9c3   : > { %v2226_v13 = vadd.f32 %v3007_v10, %v2225_v11  ;;  %v3254_v14 = vpop.f32.mrb[11].mxu0 }
 0x9c5   : > { %v2306_v15 = vmul.f32 %v2303_v12, %v2226_v13 }
 0x9c7   : > { %v2307_v16 = vadd.f32 %v2306_v15, %v2150_v8 }
 0x9ca   : > { %v2381_v18 = vpop.f32.mrb[12].mxu0 }
 0x9cb   : > { %v2382_v20 = vadd.f32 %v3018_v2, %v2381_v18  ;;  %v3276_v21 = vpop.f32.mrb[13].mxu0 }
 0x9cd   : > { %v2462_v22 = vmul.f32 %v2459_v19, %v2382_v20 }
 0x9cf   : > { %v2463_v23 = vadd.f32 %v2462_v22, %v2307_v16 }
 0x9d1   : > { %3297 = vmatmul.mubr.msk.f32.vlgmr.msra.gmra.mrb[14].mxu0 %vm1204_vm1, %v2463_v23 }
 0x9d2   : > { %3318 = vmatprep.mubr.msk.f32.mxu0 %vm4215_vm0, %v4216_v3  ;;  %3432 = vmatpush3.bf16.msra.mxu0 %v3431_v34 }
 0xaa4   : > { %v2538_v29 = vpop.f32.mrb[14].mxu0 }
 0xaa5   : > { %v2539_v30 = vadd.f32 %v2538_v29, %v2468_v28  ;;  %v3298_v31 = vpop.f32.mrb[15].mxu0 }
 0xaa7   : > { %3312 = vmatmul.mubr.msk.f32.vlgmr.msra.gmra.mrb[14].mxu1 %vm1840_vm5, %v2539_v30 }
 0xb7a   : > { %v2618_v3 = vpop.f32.mrb[14].mxu1 }
 0xb7b   : > { %v2619_v36 = vadd.f32 %v2618_v3, %v2548_v35  ;;  %v3313_v37 = vpop.f32.mrb[15].mxu1 }
 0xb7d   : > { %3674 = vtanh.f32 %v2619_v36 }
 0xb87   : > { %v3675_v38 = vpop.eup %3674 }
 0xb88   : > { %3319 = vmatmul.mubr.msk.f32.vlgmr.msra.gmra.mrb[16].mxu0 %vm2626_vm6, %v3675_v38 }
 0xc5b   : > { %v2696_v51 = vpop.f32.mrb[16].mxu0 }
 0xc5c   : > { %v2697_v40 = vadd.f32 %v2696_v51, %v2625_v39  ;;  %v3320_v41 = vpop.f32.mrb[17].mxu0 }
 0xc5e   : > { %2701 = vst.msk [vmem:[%s1184_s6] sm:$0x1] %vm2700_vm7, %v2697_v40 }
 0xc5f   : > { %4083 = shalt.err (!%p4080_p10)
}
 0xc60   : > { %s4084_s12 = scalar_lea.hbm %s4904_s2, 16  ;;  %s4088_s6 = scalar_lea.hbm %s5050_s4, 32 }
 0xc61   : > { %p4085_p11 = scmp.ne.s32.totalorder %s4904_s2, %s4084_s12  ;;  %p4089_p12 = scmp.lt.u32.totalorder %s4904_s2, %s5050_s4 }
 0xc62   : > { %p4090_p0 = scmp.lt.u32.totalorder %s4088_s6, %s4084_s12  ;;  %p4092_p7 = scmp.lt.u32.totalorder %s4084_s12, %s4904_s2 }
 0xc63   : > { %p4086_p13 = pnand %p4085_p11, %p5051_p9 }
 0xc64   : > { %p4091_p6 = por %p4090_p0, %p4089_p12 }
 0xc65   : > { %p4087_p1 = pneg %p4086_p13 }
 0xc66   : > { %p4093_p8 = por %p4092_p7, %p4091_p6 }
 0xc68   : > { %p4094_p4 = pnand %p4093_p8, %p4087_p1 }
 0xc6a   : > { %4097 = shalt.err (!%p4094_p4)
}
 0xc6b   : > { %3487 = dma.vmem_to_hbm [thread:$0]  (%p5051_p9), %s4906_s9, 16, %s4904_s2, %s2703_s10  }
 0xc6c PF: > { %s2727_s8 = sand.u32 1, %s4152_s27   ;;  %p5052_p3 = scmp.ne.s32.totalorder %s5017_s11, 0 }
 0xc6d   : > { %p5053_p2 = scmp.ge.s32.totalorder %s4164_s0, 2  ;;  %s2728_s14 = scalar_lea.sflag [#allocation6], %s2727_s8 }
 0xc6f   : > { %p3534_p5 = pnand %p5053_p2, %p5052_p3 }
 0xc71   : > { %4147 = dma.done.wait (!%p3534_p5), %s2728_s14, 16  }
 0xc72   : > { %4149 = vsyncadd (!%p3534_p5), %s2728_s14, 4294967280  ;;  %p89_p10 = scmp.ge.s32.totalorder %s4613_s3, 4   ;;  %s5054_s27 = smov %s4156_s28 }
 0xc73   : > { %s5055_s28 = smov %s4160_s1  ;;  %s5056_s1 = smov %s4625_s13 }
 0xc74   : > { %s5057_s0 = smov %s4613_s3  ;;  %91 = sbr.rel (!%p89_p10) target bundleno = 75 (0x4b), region = 288 }
 0xc7b   :  { %2732 = vsyncpa [#allocation5], 1 }
 0xc7c   :  { %2734 = vsyncpa [#allocation5 + $0x1], 1 }
 0xc7d   :  { %2735 = vsyncpa [#allocation8], 1 }
 0xc7e   :  { %2736 = vsyncpa [#allocation11], 1 }
 0xc7f   :  { %2737 = vsyncpa [#allocation14], 1 }
 0xc80   :  { %2738 = vsyncpa [#allocation17], 1 }
 0xc81   :  { %2739 = vsyncpa [#allocation20], 1 }
 0xc82   :  { %2740 = vsyncpa [#allocation23], 1 }
 0xc83   :  { %2741 = vsyncpa [#allocation26], 1 }
 0xc84   :  { %2742 = vsyncpa [#allocation6], 1 }
 0xc85   :  { %2744 = vsyncpa [#allocation6 + $0x1], 1 }

</bundles_post_ra>
